<compile_context>
chip_gen: v7x
topology: tpu7x:2x2x1
jax: 0.10.0
libtpu: 0.0.40
codegen_flags: <defaults>
</compile_context>

<pallas_src>
import jax
import jax.numpy as jnp
import numpy as np
from jax.experimental import pallas as pl
from jax.experimental.pallas import tpu as pltpu

_HI = jax.lax.Precision.HIGHEST  # f32-accurate MXU passes (parity with the reference)
_OUT_LANES = 128                 # lane-dense packed output width


def attention_kernel(q_ref, topics_ref, cov_ref, ua_t_ref, wa_t_ref, va_ref,
                     va_b_ref, out_ref):
    B, T, E = topics_ref.shape

    q = q_ref[...]                      # (B, H)
    topics = topics_ref[...]            # (B, T, E)
    cov = cov_ref[...]                  # (B, T)
    ua_t = ua_t_ref[...]                # (E, H)  = Ua^T
    wa_t = wa_t_ref[...]                # (H, H)  = Wa^T
    va = va_ref[...]                    # (1, H)  = va weight row
    va_b = va_b_ref[0, 0]               # scalar bias from SMEM

    # Per-topic unrolled loop (T is small and static).  The q-chain is serially
    # dependent by construction (matches PyTorch exactly); the Ua dots interleave
    # freely with it on the MXU.
    cols = []
    for t in range(T):
        q = jnp.dot(q, wa_t, preferred_element_type=jnp.float32, precision=_HI)
        proj = jnp.dot(topics[:, t, :], ua_t,
                       preferred_element_type=jnp.float32, precision=_HI)
        h = jnp.tanh(q + proj)                                   # (B, H)  VPU/EUP
        cols.append(jnp.sum(h * va, axis=1, keepdims=True))      # (B, 1)  VPU + lane reduce
    scores = (jnp.concatenate(cols, axis=1) + va_b) * cov        # (B, T)

    # Softmax over the topic axis.
    m = jnp.max(scores, axis=1, keepdims=True)
    e = jnp.exp(scores - m)
    alphas = e / jnp.sum(e, axis=1, keepdims=True)               # (B, T)

    # mt = bmm(alphas.unsqueeze(1), topics).squeeze(1)
    mt = jnp.sum(alphas[:, :, None] * topics, axis=1)            # (B, E)

    # Pack both outputs into one lane-dense slab: [ mt | alphas | zeros ].
    pad = jnp.zeros((B, _OUT_LANES - E - T), jnp.float32)
    out_ref[...] = jnp.concatenate([mt, alphas, pad], axis=1).astype(out_ref.dtype)


def prepare_attention_params(ua_w, wa_w, va_w, va_b):
    """One-time (parameter-init-time) preprocessing: just transposes + bias shaping."""
    return ua_w.T, wa_w.T, va_w, va_b.reshape(1, 1)


@jax.jit
def attention_forward(query, topics, coverage_vector, ua_t, wa_t, va_row, va_b2):
    """query (B,H), topics (B,T,E), coverage (B,T); weights pre-prepared once."""
    B, T, E = topics.shape
    H = query.shape[1]

    # Tiny advisory cost for XLA's scheduler.
    flops = T * (2 * B * H * H + 2 * B * E * H + 2 * B * H) + 2 * B * T * E + 6 * B * T
    transcendentals = T * B * H + B * T
    bytes_accessed = 4 * (B * H + B * T * E + B * T + E * H + H * H + H + 1
                          + B * _OUT_LANES)

    vmem = pl.BlockSpec(memory_space=pltpu.MemorySpace.VMEM)
    smem = pl.BlockSpec(memory_space=pltpu.MemorySpace.SMEM)

    packed = pl.pallas_call(
        attention_kernel,
        out_shape=jax.ShapeDtypeStruct((B, _OUT_LANES), jnp.float32),
        in_specs=[vmem, vmem, vmem, vmem, vmem, vmem, smem],
        out_specs=vmem,
        cost_estimate=pl.CostEstimate(flops=flops,
                                      transcendentals=transcendentals,
                                      bytes_accessed=bytes_accessed),
    )(query, topics, coverage_vector, ua_t, wa_t, va_row, va_b2)

    mt = packed[:, :E]
    alphas = packed[:, E:E + T]
    return mt, alphas


def attention_reference(query, topics, coverage_vector, ua_w, wa_w, va_w, va_b):
    """Plain-JAX transcription of the PyTorch forward, for verification."""
    B, T, E = topics.shape
    q = query
    scores = []
    for i in range(T):
        proj_key = jnp.dot(topics[:, i, :], ua_w.T, precision=_HI)
        q = jnp.dot(q, wa_w.T, precision=_HI)
        s = jnp.dot(jnp.tanh(q + proj_key), va_w.T, precision=_HI) + va_b   # (B, 1)
        scores.append(s * coverage_vector[:, i:i + 1])
    scores = jnp.concatenate(scores, axis=1)                                # (B, T)
    alphas = jax.nn.softmax(scores, axis=1)
    mt = jnp.einsum('bt,bte->be', alphas, topics, precision=_HI)
    return mt, alphas


if __name__ == "__main__":
    B, T, H, E = 2, 8, 32, 32   # batch, num_topics, hidden_size, embed_size

    key = jax.random.PRNGKey(0)
    ks = jax.random.split(key, 7)

    # Deterministic parameter init (PyTorch nn.Linear shapes: (out, in)).
    ua_w = jax.random.normal(ks[0], (H, E), jnp.float32) * 0.1
    wa_w = jax.random.normal(ks[1], (H, H), jnp.float32) * 0.1
    va_w = jax.random.normal(ks[2], (1, H), jnp.float32) * 0.1
    va_b = jax.random.normal(ks[3], (1,), jnp.float32) * 0.1

    # Example inputs.
    query = jax.random.normal(ks[4], (B, H), jnp.float32)
    topics = jax.random.normal(ks[5], (B, T, E), jnp.float32)
    coverage_vector = jax.random.uniform(ks[6], (B, T), jnp.float32)

    # One-time weight preparation (hoisted out of the per-call path).
    params = prepare_attention_params(ua_w, wa_w, va_w, va_b)

    mt, alphas = attention_forward(query, topics, coverage_vector, *params)
    jax.block_until_ready((mt, alphas))

    mt_want, alphas_want = attention_reference(query, topics, coverage_vector,
                                               ua_w, wa_w, va_w, va_b)
    np.testing.assert_allclose(np.asarray(mt), np.asarray(mt_want), rtol=2e-4, atol=2e-5)
    np.testing.assert_allclose(np.asarray(alphas), np.asarray(alphas_want), rtol=2e-4, atol=2e-5)

    print("KERNEL_OK")
</pallas_src>

<mosaic_0001>
module attributes {stable_mosaic.version = 11 : i64} {
  func.func @attention_kernel(%arg0: memref<2x32xf32, #tpu.memory_space<vmem>>, %arg1: memref<2x8x32xf32, #tpu.memory_space<vmem>>, %arg2: memref<2x8xf32, #tpu.memory_space<vmem>>, %arg3: memref<32x32xf32, #tpu.memory_space<vmem>>, %arg4: memref<32x32xf32, #tpu.memory_space<vmem>>, %arg5: memref<1x32xf32, #tpu.memory_space<vmem>>, %arg6: memref<1x1xf32, #tpu.memory_space<smem>>, %arg7: memref<2x128xf32, #tpu.memory_space<vmem>>) attributes {dimension_semantics = [], scalar_prefetch = 0 : i64, scratch_operands = 0 : i64, tpu.core_type = #tpu.core_type<tc>} {
    %c0 = arith.constant 0 : index
    %c0_0 = arith.constant 0 : index
    %0 = vector.load %arg0[%c0, %c0_0] : memref<2x32xf32, #tpu.memory_space<vmem>>, vector<2x32xf32>
    %c0_1 = arith.constant 0 : index
    %c0_2 = arith.constant 0 : index
    %c0_3 = arith.constant 0 : index
    %1 = vector.load %arg1[%c0_1, %c0_2, %c0_3] : memref<2x8x32xf32, #tpu.memory_space<vmem>>, vector<2x8x32xf32>
    %c0_4 = arith.constant 0 : index
    %c0_5 = arith.constant 0 : index
    %2 = vector.load %arg2[%c0_4, %c0_5] : memref<2x8xf32, #tpu.memory_space<vmem>>, vector<2x8xf32>
    %c0_6 = arith.constant 0 : index
    %c0_7 = arith.constant 0 : index
    %3 = vector.load %arg3[%c0_6, %c0_7] : memref<32x32xf32, #tpu.memory_space<vmem>>, vector<32x32xf32>
    %c0_8 = arith.constant 0 : index
    %c0_9 = arith.constant 0 : index
    %4 = vector.load %arg4[%c0_8, %c0_9] : memref<32x32xf32, #tpu.memory_space<vmem>>, vector<32x32xf32>
    %c0_10 = arith.constant 0 : index
    %c0_11 = arith.constant 0 : index
    %5 = vector.load %arg5[%c0_10, %c0_11] : memref<1x32xf32, #tpu.memory_space<vmem>>, vector<1x32xf32>
    %c0_12 = arith.constant 0 : index
    %c0_13 = arith.constant 0 : index
    %6 = memref.load %arg6[%c0_12, %c0_13] : memref<1x1xf32, #tpu.memory_space<smem>>
    %cst = arith.constant dense<0.000000e+00> : vector<2x32xf32>
    %7 = tpu.matmul %0, %4, %cst {dimension_numbers = #tpu.dot_dimension_numbers<[1], [0], [0], [1], [0, 0, 1, 1], [], []>, precision = #tpu.contract_precision<fp32>} : vector<2x32xf32>, vector<32x32xf32>, vector<2x32xf32> -> vector<2x32xf32>
    %8 = vector.extract_strided_slice %1 {offsets = [0, 0, 0], sizes = [2, 1, 32], strides = [1, 1, 1]} : vector<2x8x32xf32> to vector<2x1x32xf32>
    %9 = vector.shape_cast %8 : vector<2x1x32xf32> to vector<2x32xf32>
    %cst_14 = arith.constant dense<0.000000e+00> : vector<2x32xf32>
    %10 = tpu.matmul %9, %3, %cst_14 {dimension_numbers = #tpu.dot_dimension_numbers<[1], [0], [0], [1], [0, 0, 1, 1], [], []>, precision = #tpu.contract_precision<fp32>} : vector<2x32xf32>, vector<32x32xf32>, vector<2x32xf32> -> vector<2x32xf32>
    %11 = arith.addf %7, %10 : vector<2x32xf32>
    %12 = math.tanh %11 : vector<2x32xf32>
    %13 = vector.broadcast %5 : vector<1x32xf32> to vector<2x32xf32>
    %14 = arith.mulf %12, %13 : vector<2x32xf32>
    %cst_15 = arith.constant dense<0.000000e+00> : vector<2xf32>
    %15 = vector.multi_reduction <add>, %14, %cst_15 [1] : vector<2x32xf32> to vector<2xf32>
    %16 = vector.shape_cast %15 : vector<2xf32> to vector<2x1xf32>
    %cst_16 = arith.constant dense<0.000000e+00> : vector<2x32xf32>
    %17 = tpu.matmul %7, %4, %cst_16 {dimension_numbers = #tpu.dot_dimension_numbers<[1], [0], [0], [1], [0, 0, 1, 1], [], []>, precision = #tpu.contract_precision<fp32>} : vector<2x32xf32>, vector<32x32xf32>, vector<2x32xf32> -> vector<2x32xf32>
    %18 = vector.extract_strided_slice %1 {offsets = [0, 1, 0], sizes = [2, 1, 32], strides = [1, 1, 1]} : vector<2x8x32xf32> to vector<2x1x32xf32>
    %19 = vector.shape_cast %18 : vector<2x1x32xf32> to vector<2x32xf32>
    %cst_17 = arith.constant dense<0.000000e+00> : vector<2x32xf32>
    %20 = tpu.matmul %19, %3, %cst_17 {dimension_numbers = #tpu.dot_dimension_numbers<[1], [0], [0], [1], [0, 0, 1, 1], [], []>, precision = #tpu.contract_precision<fp32>} : vector<2x32xf32>, vector<32x32xf32>, vector<2x32xf32> -> vector<2x32xf32>
    %21 = arith.addf %17, %20 : vector<2x32xf32>
    %22 = math.tanh %21 : vector<2x32xf32>
    %23 = vector.broadcast %5 : vector<1x32xf32> to vector<2x32xf32>
    %24 = arith.mulf %22, %23 : vector<2x32xf32>
    %cst_18 = arith.constant dense<0.000000e+00> : vector<2xf32>
    %25 = vector.multi_reduction <add>, %24, %cst_18 [1] : vector<2x32xf32> to vector<2xf32>
    %26 = vector.shape_cast %25 : vector<2xf32> to vector<2x1xf32>
    %cst_19 = arith.constant dense<0.000000e+00> : vector<2x32xf32>
    %27 = tpu.matmul %17, %4, %cst_19 {dimension_numbers = #tpu.dot_dimension_numbers<[1], [0], [0], [1], [0, 0, 1, 1], [], []>, precision = #tpu.contract_precision<fp32>} : vector<2x32xf32>, vector<32x32xf32>, vector<2x32xf32> -> vector<2x32xf32>
    %28 = vector.extract_strided_slice %1 {offsets = [0, 2, 0], sizes = [2, 1, 32], strides = [1, 1, 1]} : vector<2x8x32xf32> to vector<2x1x32xf32>
    %29 = vector.shape_cast %28 : vector<2x1x32xf32> to vector<2x32xf32>
    %cst_20 = arith.constant dense<0.000000e+00> : vector<2x32xf32>
    %30 = tpu.matmul %29, %3, %cst_20 {dimension_numbers = #tpu.dot_dimension_numbers<[1], [0], [0], [1], [0, 0, 1, 1], [], []>, precision = #tpu.contract_precision<fp32>} : vector<2x32xf32>, vector<32x32xf32>, vector<2x32xf32> -> vector<2x32xf32>
    %31 = arith.addf %27, %30 : vector<2x32xf32>
    %32 = math.tanh %31 : vector<2x32xf32>
    %33 = vector.broadcast %5 : vector<1x32xf32> to vector<2x32xf32>
    %34 = arith.mulf %32, %33 : vector<2x32xf32>
    %cst_21 = arith.constant dense<0.000000e+00> : vector<2xf32>
    %35 = vector.multi_reduction <add>, %34, %cst_21 [1] : vector<2x32xf32> to vector<2xf32>
    %36 = vector.shape_cast %35 : vector<2xf32> to vector<2x1xf32>
    %cst_22 = arith.constant dense<0.000000e+00> : vector<2x32xf32>
    %37 = tpu.matmul %27, %4, %cst_22 {dimension_numbers = #tpu.dot_dimension_numbers<[1], [0], [0], [1], [0, 0, 1, 1], [], []>, precision = #tpu.contract_precision<fp32>} : vector<2x32xf32>, vector<32x32xf32>, vector<2x32xf32> -> vector<2x32xf32>
    %38 = vector.extract_strided_slice %1 {offsets = [0, 3, 0], sizes = [2, 1, 32], strides = [1, 1, 1]} : vector<2x8x32xf32> to vector<2x1x32xf32>
    %39 = vector.shape_cast %38 : vector<2x1x32xf32> to vector<2x32xf32>
    %cst_23 = arith.constant dense<0.000000e+00> : vector<2x32xf32>
    %40 = tpu.matmul %39, %3, %cst_23 {dimension_numbers = #tpu.dot_dimension_numbers<[1], [0], [0], [1], [0, 0, 1, 1], [], []>, precision = #tpu.contract_precision<fp32>} : vector<2x32xf32>, vector<32x32xf32>, vector<2x32xf32> -> vector<2x32xf32>
    %41 = arith.addf %37, %40 : vector<2x32xf32>
    %42 = math.tanh %41 : vector<2x32xf32>
    %43 = vector.broadcast %5 : vector<1x32xf32> to vector<2x32xf32>
    %44 = arith.mulf %42, %43 : vector<2x32xf32>
    %cst_24 = arith.constant dense<0.000000e+00> : vector<2xf32>
    %45 = vector.multi_reduction <add>, %44, %cst_24 [1] : vector<2x32xf32> to vector<2xf32>
    %46 = vector.shape_cast %45 : vector<2xf32> to vector<2x1xf32>
    %cst_25 = arith.constant dense<0.000000e+00> : vector<2x32xf32>
    %47 = tpu.matmul %37, %4, %cst_25 {dimension_numbers = #tpu.dot_dimension_numbers<[1], [0], [0], [1], [0, 0, 1, 1], [], []>, precision = #tpu.contract_precision<fp32>} : vector<2x32xf32>, vector<32x32xf32>, vector<2x32xf32> -> vector<2x32xf32>
    %48 = vector.extract_strided_slice %1 {offsets = [0, 4, 0], sizes = [2, 1, 32], strides = [1, 1, 1]} : vector<2x8x32xf32> to vector<2x1x32xf32>
    %49 = vector.shape_cast %48 : vector<2x1x32xf32> to vector<2x32xf32>
    %cst_26 = arith.constant dense<0.000000e+00> : vector<2x32xf32>
    %50 = tpu.matmul %49, %3, %cst_26 {dimension_numbers = #tpu.dot_dimension_numbers<[1], [0], [0], [1], [0, 0, 1, 1], [], []>, precision = #tpu.contract_precision<fp32>} : vector<2x32xf32>, vector<32x32xf32>, vector<2x32xf32> -> vector<2x32xf32>
    %51 = arith.addf %47, %50 : vector<2x32xf32>
    %52 = math.tanh %51 : vector<2x32xf32>
    %53 = vector.broadcast %5 : vector<1x32xf32> to vector<2x32xf32>
    %54 = arith.mulf %52, %53 : vector<2x32xf32>
    %cst_27 = arith.constant dense<0.000000e+00> : vector<2xf32>
    %55 = vector.multi_reduction <add>, %54, %cst_27 [1] : vector<2x32xf32> to vector<2xf32>
    %56 = vector.shape_cast %55 : vector<2xf32> to vector<2x1xf32>
    %cst_28 = arith.constant dense<0.000000e+00> : vector<2x32xf32>
    %57 = tpu.matmul %47, %4, %cst_28 {dimension_numbers = #tpu.dot_dimension_numbers<[1], [0], [0], [1], [0, 0, 1, 1], [], []>, precision = #tpu.contract_precision<fp32>} : vector<2x32xf32>, vector<32x32xf32>, vector<2x32xf32> -> vector<2x32xf32>
    %58 = vector.extract_strided_slice %1 {offsets = [0, 5, 0], sizes = [2, 1, 32], strides = [1, 1, 1]} : vector<2x8x32xf32> to vector<2x1x32xf32>
    %59 = vector.shape_cast %58 : vector<2x1x32xf32> to vector<2x32xf32>
    %cst_29 = arith.constant dense<0.000000e+00> : vector<2x32xf32>
    %60 = tpu.matmul %59, %3, %cst_29 {dimension_numbers = #tpu.dot_dimension_numbers<[1], [0], [0], [1], [0, 0, 1, 1], [], []>, precision = #tpu.contract_precision<fp32>} : vector<2x32xf32>, vector<32x32xf32>, vector<2x32xf32> -> vector<2x32xf32>
    %61 = arith.addf %57, %60 : vector<2x32xf32>
    %62 = math.tanh %61 : vector<2x32xf32>
    %63 = vector.broadcast %5 : vector<1x32xf32> to vector<2x32xf32>
    %64 = arith.mulf %62, %63 : vector<2x32xf32>
    %cst_30 = arith.constant dense<0.000000e+00> : vector<2xf32>
    %65 = vector.multi_reduction <add>, %64, %cst_30 [1] : vector<2x32xf32> to vector<2xf32>
    %66 = vector.shape_cast %65 : vector<2xf32> to vector<2x1xf32>
    %cst_31 = arith.constant dense<0.000000e+00> : vector<2x32xf32>
    %67 = tpu.matmul %57, %4, %cst_31 {dimension_numbers = #tpu.dot_dimension_numbers<[1], [0], [0], [1], [0, 0, 1, 1], [], []>, precision = #tpu.contract_precision<fp32>} : vector<2x32xf32>, vector<32x32xf32>, vector<2x32xf32> -> vector<2x32xf32>
    %68 = vector.extract_strided_slice %1 {offsets = [0, 6, 0], sizes = [2, 1, 32], strides = [1, 1, 1]} : vector<2x8x32xf32> to vector<2x1x32xf32>
    %69 = vector.shape_cast %68 : vector<2x1x32xf32> to vector<2x32xf32>
    %cst_32 = arith.constant dense<0.000000e+00> : vector<2x32xf32>
    %70 = tpu.matmul %69, %3, %cst_32 {dimension_numbers = #tpu.dot_dimension_numbers<[1], [0], [0], [1], [0, 0, 1, 1], [], []>, precision = #tpu.contract_precision<fp32>} : vector<2x32xf32>, vector<32x32xf32>, vector<2x32xf32> -> vector<2x32xf32>
    %71 = arith.addf %67, %70 : vector<2x32xf32>
    %72 = math.tanh %71 : vector<2x32xf32>
    %73 = vector.broadcast %5 : vector<1x32xf32> to vector<2x32xf32>
    %74 = arith.mulf %72, %73 : vector<2x32xf32>
    %cst_33 = arith.constant dense<0.000000e+00> : vector<2xf32>
    %75 = vector.multi_reduction <add>, %74, %cst_33 [1] : vector<2x32xf32> to vector<2xf32>
    %76 = vector.shape_cast %75 : vector<2xf32> to vector<2x1xf32>
    %cst_34 = arith.constant dense<0.000000e+00> : vector<2x32xf32>
    %77 = tpu.matmul %67, %4, %cst_34 {dimension_numbers = #tpu.dot_dimension_numbers<[1], [0], [0], [1], [0, 0, 1, 1], [], []>, precision = #tpu.contract_precision<fp32>} : vector<2x32xf32>, vector<32x32xf32>, vector<2x32xf32> -> vector<2x32xf32>
    %78 = vector.extract_strided_slice %1 {offsets = [0, 7, 0], sizes = [2, 1, 32], strides = [1, 1, 1]} : vector<2x8x32xf32> to vector<2x1x32xf32>
    %79 = vector.shape_cast %78 : vector<2x1x32xf32> to vector<2x32xf32>
    %cst_35 = arith.constant dense<0.000000e+00> : vector<2x32xf32>
    %80 = tpu.matmul %79, %3, %cst_35 {dimension_numbers = #tpu.dot_dimension_numbers<[1], [0], [0], [1], [0, 0, 1, 1], [], []>, precision = #tpu.contract_precision<fp32>} : vector<2x32xf32>, vector<32x32xf32>, vector<2x32xf32> -> vector<2x32xf32>
    %81 = arith.addf %77, %80 : vector<2x32xf32>
    %82 = math.tanh %81 : vector<2x32xf32>
    %83 = vector.broadcast %5 : vector<1x32xf32> to vector<2x32xf32>
    %84 = arith.mulf %82, %83 : vector<2x32xf32>
    %cst_36 = arith.constant dense<0.000000e+00> : vector<2xf32>
    %85 = vector.multi_reduction <add>, %84, %cst_36 [1] : vector<2x32xf32> to vector<2xf32>
    %86 = vector.shape_cast %85 : vector<2xf32> to vector<2x1xf32>
    %87 = tpu.concatenate %16, %26, %36, %46, %56, %66, %76, %86 in 1 : vector<2x1xf32>, vector<2x1xf32>, vector<2x1xf32>, vector<2x1xf32>, vector<2x1xf32>, vector<2x1xf32>, vector<2x1xf32>, vector<2x1xf32> -> vector<2x8xf32>
    %88 = vector.broadcast %6 : f32 to vector<2x8xf32>
    %89 = arith.addf %87, %88 : vector<2x8xf32>
    %90 = arith.mulf %89, %2 : vector<2x8xf32>
    %cst_37 = arith.constant dense<0xFF800000> : vector<2xf32>
    %91 = vector.multi_reduction <maximumf>, %90, %cst_37 [1] : vector<2x8xf32> to vector<2xf32>
    %92 = vector.shape_cast %91 : vector<2xf32> to vector<2x1xf32>
    %93 = vector.broadcast %92 : vector<2x1xf32> to vector<2x8xf32>
    %94 = arith.subf %90, %93 : vector<2x8xf32>
    %95 = math.exp %94 : vector<2x8xf32>
    %cst_38 = arith.constant dense<0.000000e+00> : vector<2xf32>
    %96 = vector.multi_reduction <add>, %95, %cst_38 [1] : vector<2x8xf32> to vector<2xf32>
    %97 = vector.shape_cast %96 : vector<2xf32> to vector<2x1xf32>
    %98 = vector.broadcast %97 : vector<2x1xf32> to vector<2x8xf32>
    %99 = arith.divf %95, %98 : vector<2x8xf32>
    %100 = vector.shape_cast %99 : vector<2x8xf32> to vector<2x8x1xf32>
    %101 = vector.broadcast %100 : vector<2x8x1xf32> to vector<2x8x32xf32>
    %102 = arith.mulf %101, %1 : vector<2x8x32xf32>
    %cst_39 = arith.constant dense<0.000000e+00> : vector<2x32xf32>
    %103 = vector.multi_reduction <add>, %102, %cst_39 [1] : vector<2x8x32xf32> to vector<2x32xf32>
    %cst_40 = arith.constant 0.000000e+00 : f32
    %104 = vector.broadcast %cst_40 : f32 to vector<2x88xf32>
    %105 = tpu.concatenate %103, %99, %104 in 1 : vector<2x32xf32>, vector<2x8xf32>, vector<2x88xf32> -> vector<2x128xf32>
    %c0_41 = arith.constant 0 : index
    %c0_42 = arith.constant 0 : index
    %106 = vector.load %arg7[%c0_41, %c0_42] : memref<2x128xf32, #tpu.memory_space<vmem>>, vector<2x128xf32>
    tpu.vector_store %arg7[%c0_41, %c0_42], %105 {strides = array<i32>} : memref<2x128xf32, #tpu.memory_space<vmem>>, vector<2x128xf32>,
    return
  }
}

</mosaic_0001>

<bundles_post_ra>
// kernel: attention_forward.1
= control target key start
LH: loop header
LB: loop body
LE: loop exit
PB: predicated region body
PF: predicated region fallthrough
CT: control target
= control target key end

     0   :  { %13 = vsyncpa [#allocation4], 0  ;;  %s11159_s0 = inlined_call_operand.vmem [shape: f32[2,32], index: 0, kind: input, shape index: {}]   ;;  %s11160_s1 = inlined_call_operand.hbm [shape: f32[2,8,32], index: 1, kind: input, shape index: {}]   ;;  %s11161_s2 = inlined_call_operand.vmem [shape: f32[2,8], index: 2, kind: input, shape index: {}]   ;;  %s11162_s3 = inlined_call_operand.hbm [shape: f32[32,32], index: 3, kind: input, shape index: {}]   ;;  %s11163_s4 = inlined_call_operand.hbm [shape: f32[32,32], index: 4, kind: input, shape index: {}]   ;;  %s11164_s5 = inlined_call_operand.vmem [shape: f32[1,32], index: 5, kind: input, shape index: {}]   ;;  %s11165_s6 = inlined_call_operand.<no memory space> [shape: f32[1,1], index: 6, kind: input, shape index: {}]   ;;  %s11166_s7 = inlined_call_operand.vmem [shape: f32[2,128], index: 7, kind: output, shape index: {}]  }
   0x1   :  { %14 = vsyncpa [#allocation6], 0  ;;  %s10346_s24 = smov [#allocation5]   ;;  %s10347_s26 = smov [#allocation3]  }
   0x2   :  { %s36_s25 = sshll.u32 %s10346_s24, 4  ;;  %s22_s27 = sshll.u32 %s10347_s26, 4  ;;  %s37_s25 = int_to_ptr.vmem [resolvable:$true] %s36_s25  ;;  %s10395_s27 = int_to_ptr.vmem [resolvable:$true] %s22_s27 }
   0x3   :  { %s10276_s30 = scalar_lea.hbm %s11162_s3, 512 }
   0x4   :  { %p10277_p0 = scmp.ne.s32.totalorder %s11162_s3, %s10276_s30  ;;  %p10280_p1 = scmp.lt.u32.totalorder %s10276_s30, %s11162_s3 }
   0x6   :  { %p10282_p2 = pnand %p10280_p1, %p10277_p0 }
   0x8   :  { %10285 = shalt.err (!%p10282_p2)
}
   0x9   :  { %s10286_s12 = scalar_lea.vmem %s37_s25, 512  ;;  %p10291_p4 = scmp.lt.s32.totalorder %s37_s25, %s37_s25 }
   0xa   :  { %p10287_p3 = scmp.ne.s32.totalorder %s37_s25, %s10286_s12  ;;  %p10292_p5 = scmp.lt.s32.totalorder %s10286_s12, %s10286_s12 }
   0xc   :  { %p10293_p6 = por %p10292_p5, %p10291_p4 }
   0xe   :  { %p10294_p7 = pnand %p10293_p6, %p10287_p3 }
  0x10   :  { %10297 = shalt.err (!%p10294_p7)
}
  0x11   :  { %s10348_s13 = smov 128   ;;  %s10349_s14 = smov 8  }
  0x12   :  { %42 = dma.hbm_to_vmem [thread:$0]  %s11162_s3, 512, %s37_s25, [#allocation6], %s10348_s13, %s10348_s13, %s10349_s14  }
  0x13   :  { %s10298_s19 = scalar_lea.hbm %s11160_s1, 256 }
  0x14   :  { %p10299_p8 = scmp.ne.s32.totalorder %s11160_s1, %s10298_s19  ;;  %p10302_p9 = scmp.lt.u32.totalorder %s10298_s19, %s11160_s1 }
  0x16   :  { %p10304_p10 = pnand %p10302_p9, %p10299_p8 }
  0x18   :  { %10307 = shalt.err (!%p10304_p10)
}
  0x19   :  { %s10308_s24 = scalar_lea.vmem %s10395_s27, 256  ;;  %p10313_p12 = scmp.lt.s32.totalorder %s10395_s27, %s10395_s27 }
  0x1a   :  { %p10309_p11 = scmp.ne.s32.totalorder %s10395_s27, %s10308_s24  ;;  %p10314_p13 = scmp.lt.s32.totalorder %s10308_s24, %s10308_s24 }
  0x1c   :  { %p10315_p0 = por %p10314_p13, %p10313_p12 }
  0x1e   :  { %p10316_p1 = pnand %p10315_p0, %p10309_p11 }
  0x20   :  { %10319 = shalt.err (!%p10316_p1)
}
  0x21   :  { %28 = dma.hbm_to_vmem [thread:$0]  %s11160_s1, 256, %s10395_s27, [#allocation4], %s10348_s13, %s10348_s13, %s10349_s14  }
  0x22   :  { %s10350_s26 = smov [#allocation7]   ;;  %s10320_s8 = scalar_lea.hbm %s11163_s4, 512 }
  0x23   :  { %s48_s28 = sshll.u32 %s10350_s26, 4  ;;  %p10321_p2 = scmp.ne.s32.totalorder %s11163_s4, %s10320_s8  ;;  %s49_s28 = int_to_ptr.vmem [resolvable:$true] %s48_s28 }
  0x24   :  { %p10324_p3 = scmp.lt.u32.totalorder %s10320_s8, %s11163_s4 }
  0x26   :  { %p10326_p4 = pnand %p10324_p3, %p10321_p2 }
  0x28   :  { %10329 = shalt.err (!%p10326_p4)
}
  0x29   :  { %s10330_s15 = scalar_lea.vmem %s49_s28, 512  ;;  %p10335_p6 = scmp.lt.s32.totalorder %s49_s28, %s49_s28 }
  0x2a   :  { %p10331_p5 = scmp.ne.s32.totalorder %s49_s28, %s10330_s15  ;;  %p10336_p7 = scmp.lt.s32.totalorder %s10330_s15, %s10330_s15 }
  0x2c   :  { %p10337_p8 = por %p10336_p7, %p10335_p6 }
  0x2e   :  { %p10338_p9 = pnand %p10337_p8, %p10331_p5 }
  0x30   :  { %10341 = shalt.err (!%p10338_p9)
}
  0x31   :  { %54 = dma.hbm_to_vmem [thread:$0]  %s11163_s4, 512, %s49_s28, [#allocation6], %s10348_s13, %s10348_s13, %s10349_s14  }
  0x32   :  { %10342 = dma.done.wait [#allocation4], 256  }
  0x33   :  { %10343 = vsyncadd [#allocation4], 4294967040 }
  0x34   :  { %10344 = dma.done.wait [#allocation6], 1024  }
  0x35   :  { %10345 = vsyncadd [#allocation6], 4294966272  ;;  %v10351_v0 = vmov 0.0|0.0   ;;  %vm10352_vm0 = vmmov 0   ;;  %v10353_v1 = vmov 0.0   ;;  %vm82_vm1 = vcmask 261120  }
  0x36   :  { %9576 = vmatprep.subr.bf16.mxu1 %v10351_v0  ;;  %8528 = vmatprep.mubr.msk.f32.mxu1 %vm10352_vm0, %v10353_v1  ;;  %v76_v2 = vld [vmem:[#allocation7] sm:$0xff]  ;;  %v77_v3 = vld [vmem:[#allocation7 + $0x8] sm:$0xff]  ;;  %v78_v4 = vld [vmem:[#allocation7 + $0x10] sm:$0xff]  ;;  %vm574_vm2 = vcmask 1041409   ;;  %vm1072_vm3 = vcmask 254976   ;;  %vm7962_vm4 = vcmask 7168  }
  0x37   :  { %9648 = vmatprep.subr.bf16.mxu0 %v10351_v0  ;;  %8660 = vmatprep.mubr.msk.f32.mxu0 %vm10352_vm0, %v10353_v1  ;;  %v87_v5 = vand.u32 4294901760, %v76_v2  ;;  %v90_v6 = vand.u32 4294901760, %v77_v3  ;;  %v79_v7 = vld [vmem:[#allocation7 + $0x18] sm:$0xff]  ;;  %v93_v8 = vand.u32 4294901760, %v78_v4  ;;  %v68_v9 = vld [vmem:[%s11159_s0] sm:$0x3] }
  0x38   :  { %v96_v10 = vand.u32 4294901760, %v79_v7  ;;  %v84_v11 = vsel %vm82_vm1, %v68_v9, 0  ;;  %v10493_v39 = vld [vmem:[#allocation3 + $0x8] sm:$0xff]  ;;  %v10500_v41 = vld [vmem:[#allocation3] sm:$0xff]  ;;  %v72_v43 = vld [vmem:[#allocation5] sm:$0xff]  ;;  %vm7964_vm5 = vcmask 15360  }
  0x39   :  { %v10457_v12 = vpack.c.bf16 %v90_v6, %v87_v5  ;;  %v10459_v13 = vand.u32 4294901760, %v84_v11  ;;  %v167_v14 = vsub.f32 %v76_v2, %v87_v5  ;;  %v174_v15 = vsub.f32 %v77_v3, %v90_v6  ;;  %v73_v44 = vld [vmem:[#allocation5 + $0x8] sm:$0xff]  ;;  %v74_v50 = vld [vmem:[#allocation5 + $0x10] sm:$0xff]  ;;  %v75_v51 = vld [vmem:[#allocation5 + $0x18] sm:$0xff] }
  0x3a   :  { %v181_v16 = vsub.f32 %v78_v4, %v93_v8  ;;  %v188_v17 = vsub.f32 %v79_v7, %v96_v10  ;;  %v10462_v18 = vpack.c.bf16 %v96_v10, %v93_v8  ;;  %v573_v40 = vrot.slane %v10493_v39, 7 }
  0x3b   :  { %9578 = vmatpush3.bf16.msra.mxu1 %v10457_v12  ;;  %v156_v19 = vsub.f32 %v84_v11, %v10459_v13  ;;  %v168_v20 = vand.u32 4294901760, %v167_v14  ;;  %v175_v21 = vand.u32 4294901760, %v174_v15  ;;  %9650 = vmatpush3.bf16.msra.mxu0 %v10457_v12  ;;  %v10481_v37 = vpack.c.bf16 %v174_v15, %v167_v14 }
  0x3c   :  { %9579 = vmatprep.subr.bf16.mxu1 %v10351_v0  ;;  %v182_v22 = vand.u32 4294901760, %v181_v16  ;;  %v189_v23 = vand.u32 4294901760, %v188_v17  ;;  %9651 = vmatprep.subr.bf16.mxu0 %v10351_v0  ;;  %v10486_v38 = vpack.c.bf16 %v188_v17, %v181_v16  ;;  %v575_v45 = vsel %vm574_vm2, %v573_v40, %v10500_v41 }
  0x3d   :  { %v157_v24 = vand.u32 4294901760, %v156_v19  ;;  %v169_v25 = vsub.f32 %v167_v14, %v168_v20  ;;  %v176_v26 = vsub.f32 %v174_v15, %v175_v21  ;;  %v10503_v42 = vpack.c.bf16 %v175_v21, %v168_v20 }
  0x3e   :  { %v183_v27 = vsub.f32 %v181_v16, %v182_v22  ;;  %v190_v28 = vsub.f32 %v188_v17, %v189_v23  ;;  %v10509_v46 = vpack.c.bf16 %v189_v23, %v182_v22  ;;  %v579_v47 = vand.u32 4294901760, %v72_v43 }
  0x3f   :  { %9581 = vmatpush3.bf16.msra.mxu1 %v10462_v18  ;;  %v158_v29 = vsub.f32 %v156_v19, %v157_v24  ;;  %v170_v30 = vand.u32 4294901760, %v169_v25  ;;  %v177_v31 = vand.u32 4294901760, %v176_v26  ;;  %9653 = vmatpush3.bf16.msra.mxu0 %v10462_v18  ;;  %v582_v48 = vand.u32 4294901760, %v73_v44 }
  0x40   :  { %9582 = vmatprep.subr.bf16.mxu1 %v10351_v0  ;;  %v184_v32 = vand.u32 4294901760, %v183_v27  ;;  %v191_v33 = vand.u32 4294901760, %v190_v28  ;;  %9654 = vmatprep.subr.bf16.mxu0 %v10351_v0  ;;  %v576_v49 = vsel %vm82_vm1, %v575_v45, 0  ;;  %v585_v53 = vand.u32 4294901760, %v74_v50 }
  0x41   :  { %v159_v34 = vand.u32 4294901760, %v158_v29  ;;  %v10472_v35 = vpack.c.bf16 %v177_v31, %v170_v30  ;;  %v10515_v52 = vand.u32 4294901760, %v576_v49  ;;  %v588_v54 = vand.u32 4294901760, %v75_v51 }
  0x42   :  { %v10475_v36 = vpack.c.bf16 %v191_v33, %v184_v32  ;;  %v659_v55 = vsub.f32 %v72_v43, %v579_v47  ;;  %v666_v56 = vsub.f32 %v73_v44, %v582_v48  ;;  %v673_v60 = vsub.f32 %v74_v50, %v585_v53 }
  0x43   :  { %8529 = vmatmul.mubr.f32.vlgmr.msra.gmra.mrb[0].mxu1 %v159_v34  ;;  %v648_v57 = vsub.f32 %v576_v49, %v10515_v52  ;;  %v680_v61 = vsub.f32 %v75_v51, %v588_v54  ;;  %v10525_v62 = vpack.c.bf16 %v582_v48, %v579_v47  ;;  %v10530_v6 = vpack.c.bf16 %v588_v54, %v585_v53 }
  0x44   :  { %9584 = vmatpush3.bf16.msra.mxu1 %v10472_v35  ;;  %8539 = vmatprep.mubr.msk.f32.mxu1 %vm10352_vm0, %v10353_v1  ;;  %v660_v58 = vand.u32 4294901760, %v659_v55  ;;  %v667_v59 = vand.u32 4294901760, %v666_v56  ;;  %v674_v4 = vand.u32 4294901760, %v673_v60  ;;  %v1564_v23 = vrot.slane %v10500_v41, 1 }
  0x45   :  { %9585 = vmatprep.subr.bf16.mxu1 %v10351_v0  ;;  %v649_v63 = vand.u32 4294901760, %v648_v57  ;;  %v681_v5 = vand.u32 4294901760, %v680_v61  ;;  %v10552_v20 = vpack.c.bf16 %v680_v61, %v673_v60  ;;  %vm7966_vm6 = vcmask 23552  }
  0x46   :  { %v661_v2 = vsub.f32 %v659_v55, %v660_v58  ;;  %v668_v3 = vsub.f32 %v666_v56, %v667_v59  ;;  %v675_v10 = vsub.f32 %v673_v60, %v674_v4  ;;  %v10564_v21 = vpack.c.bf16 %v667_v59, %v660_v58 }
  0x47   :  { %v650_v7 = vsub.f32 %v648_v57, %v649_v63  ;;  %v682_v11 = vsub.f32 %v680_v61, %v681_v5  ;;  %v10568_v22 = vpack.c.bf16 %v681_v5, %v674_v4  ;;  %v10669_v4 = vld [vmem:[%s11164_s5] ss:$0 sm:$0xff]  ;;  %vm7968_vm7 = vcmask 31744  }
  0x48   :  { %9587 = vmatpush3.bf16.msra.mxu1 %v10475_v36  ;;  %v662_v8 = vand.u32 4294901760, %v661_v2  ;;  %v669_v9 = vand.u32 4294901760, %v668_v3  ;;  %vm7970_vm8 = vcmask 39936   ;;  %vm7972_vm9 = vcmask 48128  }
  0x49   :  { %9588 = vmatprep.subr.bf16.mxu1 %v10351_v0  ;;  %v651_v14 = vand.u32 4294901760, %v650_v7  ;;  %v683_v16 = vand.u32 4294901760, %v682_v11  ;;  %vm7974_vm10 = vcmask 56320   ;;  %vm7979_vm11 = vcmask 58368  }
  0x4a   :  { %v10537_v15 = vpack.c.bf16 %v669_v9, %v662_v8  ;;  %vm8030_vm12 = vcmask 326656  }
  0x4b   :  { %8540 = vmatmul.mubr.f32.vlgmr.msra.gmra.mrb[0].mxu1 %v10459_v13 }
  0x4c   :  { %9590 = vmatpush3.bf16.msra.mxu1 %v10481_v37  ;;  %8550 = vmatprep.mubr.msk.f32.mxu1 %vm10352_vm0, %v10353_v1 }
  0x4d   :  { %9591 = vmatprep.subr.bf16.mxu1 %v10351_v0 }
  0x50   :  { %9593 = vmatpush3.bf16.msra.mxu1 %v10486_v38 }
  0x51   :  { %9594 = vmatprep.subr.bf16.mxu1 %v10351_v0 }
  0x53   :  { %8551 = vmatmul.mubr.f32.vlgmr.msra.gmra.mrb[0].mxu1 %v156_v19  ;;  %v10547_v19 = vpack.c.bf16 %v666_v56, %v659_v55 }
  0x54   :  { %9596 = vmatpush3.bf16.msra.mxu1 %v10457_v12  ;;  %8561 = vmatprep.mubr.msk.f32.mxu1 %vm10352_vm0, %v10353_v1 }
  0x55   :  { %9597 = vmatprep.subr.bf16.mxu1 %v10351_v0 }
  0x58   :  { %9599 = vmatpush3.bf16.msra.mxu1 %v10462_v18 }
  0x59   :  { %9600 = vmatprep.subr.bf16.mxu1 %v10351_v0 }
  0x5b   :  { %8562 = vmatmul.mubr.f32.vlgmr.msra.gmra.mrb[0].mxu1 %v157_v24  ;;  %v1565_v24 = vsel %vm574_vm2, %v10493_v39, %v1564_v23 }
  0x5c   :  { %9602 = vmatpush3.bf16.msra.mxu1 %v10503_v42  ;;  %8572 = vmatprep.mubr.msk.f32.mxu1 %vm10352_vm0, %v10353_v1  ;;  %v1566_v25 = vsel %vm82_vm1, %v1565_v24, 0 }
  0x5d   :  { %9603 = vmatprep.subr.bf16.mxu1 %v10351_v0  ;;  %v1637_v26 = vand.u32 4294901760, %v1566_v25 }
  0x5f   :  { %v1638_v27 = vsub.f32 %v1566_v25, %v1637_v26 }
  0x60   :  { %9605 = vmatpush3.bf16.msra.mxu1 %v10509_v46 }
  0x61   :  { %9606 = vmatprep.subr.bf16.mxu1 %v10351_v0  ;;  %v1639_v28 = vand.u32 4294901760, %v1638_v27 }
  0x63   :  { %8573 = vmatmul.mubr.f32.vlgmr.msra.gmra.mrb[0].mxu1 %v10459_v13  ;;  %v1640_v29 = vsub.f32 %v1638_v27, %v1639_v28 }
  0x64   :  { %9608 = vmatpush3.bf16.msra.mxu1 %v10457_v12  ;;  %8583 = vmatprep.mubr.msk.f32.mxu1 %vm10352_vm0, %v10353_v1 }
  0x65   :  { %9609 = vmatprep.subr.bf16.mxu1 %v10351_v0  ;;  %v1641_v30 = vand.u32 4294901760, %v1640_v29 }
  0x68   :  { %9611 = vmatpush3.bf16.msra.mxu1 %v10462_v18 }
  0x69   :  { %9612 = vmatprep.subr.bf16.mxu1 %v10351_v0 }
  0x6b   :  { %8584 = vmatmul.mubr.f32.vlgmr.msra.gmra.mrb[0].mxu1 %v10459_v13  ;;  %v676_v13 = vand.u32 4294901760, %v675_v10 }
  0x6c   :  { %9614 = vmatpush3.bf16.msra.mxu1 %v10525_v62  ;;  %8594 = vmatprep.mubr.msk.f32.mxu1 %vm10352_vm0, %v10353_v1 }
  0x6d   :  { %9615 = vmatprep.subr.bf16.mxu1 %v10351_v0  ;;  %v10541_v17 = vpack.c.bf16 %v683_v16, %v676_v13 }
  0x70   :  { %9617 = vmatpush3.bf16.msra.mxu1 %v10530_v6 }
  0x71   :  { %9618 = vmatprep.subr.bf16.mxu1 %v10351_v0 }
  0x73   :  { %8595 = vmatmul.mubr.f32.vlgmr.msra.gmra.mrb[2].mxu1 %v651_v14 }
  0x74   :  { %9620 = vmatpush3.bf16.msra.mxu1 %v10537_v15  ;;  %8605 = vmatprep.mubr.msk.f32.mxu1 %vm10352_vm0, %v10353_v1 }
  0x75   :  { %9621 = vmatprep.subr.bf16.mxu1 %v10351_v0 }
  0x78   :  { %9623 = vmatpush3.bf16.msra.mxu1 %v10541_v17 }
  0x79   :  { %9624 = vmatprep.subr.bf16.mxu1 %v10351_v0 }
  0x7b   :  { %8606 = vmatmul.mubr.f32.vlgmr.msra.gmra.mrb[4].mxu1 %v10515_v52 }
  0x7c   :  { %9626 = vmatpush3.bf16.msra.mxu1 %v10547_v19  ;;  %8616 = vmatprep.mubr.msk.f32.mxu1 %vm10352_vm0, %v10353_v1 }
  0x7d   :  { %9627 = vmatprep.subr.bf16.mxu1 %v10351_v0 }
  0x80   :  { %9629 = vmatpush3.bf16.msra.mxu1 %v10552_v20 }
  0x81   :  { %9630 = vmatprep.subr.bf16.mxu1 %v10351_v0 }
  0x83   :  { %8617 = vmatmul.mubr.f32.vlgmr.msra.gmra.mrb[6].mxu1 %v648_v57 }
  0x84   :  { %9632 = vmatpush3.bf16.msra.mxu1 %v10525_v62  ;;  %8627 = vmatprep.mubr.msk.f32.mxu1 %vm10352_vm0, %v10353_v1 }
  0x85   :  { %9633 = vmatprep.subr.bf16.mxu1 %v10351_v0 }
  0x88   :  { %9635 = vmatpush3.bf16.msra.mxu1 %v10530_v6 }
  0x89   :  { %9636 = vmatprep.subr.bf16.mxu1 %v10351_v0 }
  0x8b   :  { %8628 = vmatmul.mubr.f32.vlgmr.msra.gmra.mrb[8].mxu1 %v649_v63 }
  0x8c   :  { %9638 = vmatpush3.bf16.msra.mxu1 %v10564_v21  ;;  %8638 = vmatprep.mubr.msk.f32.mxu1 %vm10352_vm0, %v10353_v1 }
  0x8d   :  { %9639 = vmatprep.subr.bf16.mxu1 %v10351_v0 }
  0x90   :  { %9641 = vmatpush3.bf16.msra.mxu1 %v10568_v22 }
  0x91   :  { %9642 = vmatprep.subr.bf16.mxu1 %v10351_v0 }
  0x93   :  { %8639 = vmatmul.mubr.f32.vlgmr.msra.gmra.mrb[10].mxu1 %v10515_v52 }
  0x94   :  { %9644 = vmatpush3.bf16.msra.mxu1 %v10525_v62  ;;  %8649 = vmatprep.mubr.msk.f32.mxu1 %vm10352_vm0, %v10353_v1 }
  0x95   :  { %9645 = vmatprep.subr.bf16.mxu1 %v10351_v0 }
  0x98   :  { %9647 = vmatpush3.bf16.msra.mxu1 %v10530_v6 }
  0x99   :  { %9684 = vmatprep.subr.bf16.mxu1 %v10351_v0 }
  0x9b   :  { %8650 = vmatmul.mubr.f32.vlgmr.msra.gmra.mrb[12].mxu1 %v10515_v52 }
  0x9c   :  { %9686 = vmatpush3.bf16.msra.mxu1 %v10525_v62  ;;  %8726 = vmatprep.mubr.msk.f32.mxu1 %vm10352_vm0, %v10353_v1 }
  0x9d   :  { %9687 = vmatprep.subr.bf16.mxu1 %v10351_v0 }
  0xa0   :  { %9689 = vmatpush3.bf16.msra.mxu1 %v10530_v6 }
  0xa1   :  { %9690 = vmatprep.subr.bf16.mxu1 %v10351_v0 }
  0xa3   :  { %8727 = vmatmul.mubr.f32.vlgmr.msra.gmra.mrb[14].mxu1 %v1641_v30 }
  0xa4   :  { %9692 = vmatpush3.bf16.msra.mxu1 %v10537_v15  ;;  %8737 = vmatprep.mubr.msk.f32.mxu1 %vm10352_vm0, %v10353_v1 }
  0xa5   :  { %9693 = vmatprep.subr.bf16.mxu1 %v10351_v0 }
  0xa8   :  { %9695 = vmatpush3.bf16.msra.mxu1 %v10541_v17 }
  0xa9   :  { %9696 = vmatprep.subr.bf16.mxu1 %v10351_v0 }
  0xab   :  { %8738 = vmatmul.mubr.f32.vlgmr.msra.gmra.mrb[16].mxu1 %v1637_v26 }
  0xac   :  { %9698 = vmatpush3.bf16.msra.mxu1 %v10547_v19  ;;  %8748 = vmatprep.mubr.msk.f32.mxu1 %vm10352_vm0, %v10353_v1 }
  0xad   :  { %9699 = vmatprep.subr.bf16.mxu1 %v10351_v0 }
  0xb0   :  { %9701 = vmatpush3.bf16.msra.mxu1 %v10552_v20 }
  0xb1   :  { %9702 = vmatprep.subr.bf16.mxu1 %v10351_v0 }
  0xb3   :  { %8749 = vmatmul.mubr.f32.vlgmr.msra.gmra.mrb[18].mxu1 %v1638_v27 }
  0xb4   :  { %9704 = vmatpush3.bf16.msra.mxu1 %v10525_v62  ;;  %8759 = vmatprep.mubr.msk.f32.mxu1 %vm10352_vm0, %v10353_v1 }
  0xb5   :  { %9705 = vmatprep.subr.bf16.mxu1 %v10351_v0 }
  0xb8   :  { %9707 = vmatpush3.bf16.msra.mxu1 %v10530_v6 }
  0xb9   :  { %9708 = vmatprep.subr.bf16.mxu1 %v10351_v0 }
  0xbb   :  { %8760 = vmatmul.mubr.f32.vlgmr.msra.gmra.mrb[20].mxu1 %v1639_v28 }
  0xbc   :  { %9710 = vmatpush3.bf16.msra.mxu1 %v10564_v21  ;;  %8770 = vmatprep.mubr.msk.f32.mxu1 %vm10352_vm0, %v10353_v1 }
  0xbd   :  { %9711 = vmatprep.subr.bf16.mxu1 %v10351_v0 }
  0xc0   :  { %9713 = vmatpush3.bf16.msra.mxu1 %v10568_v22 }
  0xc1   :  { %9714 = vmatprep.subr.bf16.mxu1 %v10351_v0 }
  0xc3   :  { %8771 = vmatmul.mubr.f32.vlgmr.msra.gmra.mrb[22].mxu1 %v1637_v26 }
  0xc4   :  { %9716 = vmatpush3.bf16.msra.mxu1 %v10525_v62  ;;  %8781 = vmatprep.mubr.msk.f32.mxu1 %vm10352_vm0, %v10353_v1 }
  0xc5   :  { %9717 = vmatprep.subr.bf16.mxu1 %v10351_v0 }
  0xc8   :  { %9719 = vmatpush3.bf16.msra.mxu1 %v10530_v6 }
  0xc9   :  { %9756 = vmatprep.subr.bf16.mxu1 %v10351_v0 }
  0xcb   :  { %8782 = vmatmul.mubr.f32.vlgmr.msra.gmra.mrb[24].mxu1 %v1637_v26 }
  0xcc   :  { %9758 = vmatpush3.bf16.msra.mxu1 %v10525_v62  ;;  %8858 = vmatprep.mubr.msk.f32.mxu1 %vm10352_vm0, %v10353_v1 }
  0xcd   :  { %9759 = vmatprep.subr.bf16.mxu1 %v10351_v0 }
  0xd0   :  { %9761 = vmatpush3.bf16.msra.mxu1 %v10530_v6 }
  0xd1   :  { %9762 = vmatprep.subr.bf16.mxu1 %v10351_v0 }
 0x13e   :  { %v567_v31 = vpop.f32.mrb[0].mxu1 }
 0x13f   :  { %v1077_v32 = vsel %vm82_vm1, %v567_v31, 0  ;;  %v8585_v33 = vpop.f32.mrb[1].mxu1 }
 0x140   :  { %v1148_v34 = vand.u32 4294901760, %v1077_v32 }
 0x142   :  { %v1149_v40 = vsub.f32 %v1077_v32, %v1148_v34  ;;  %v2548_v32 = vrot.slane %v10493_v39, 1 }
 0x144   :  { %v1150_v43 = vand.u32 4294901760, %v1149_v40 }
 0x146   :  { %v1151_v44 = vsub.f32 %v1149_v40, %v1150_v43  ;;  %v653_v45 = vpop.f32.mrb[2].mxu1 }
 0x147   :  { %v8596_v47 = vpop.f32.mrb[3].mxu1 }
 0x148   :  { %v1152_v48 = vand.u32 4294901760, %v1151_v44 }
 0x14a   :  { %8661 = vmatmul.mubr.f32.vlgmr.msra.gmra.mrb[0].mxu0 %v1152_v48 }
 0x14b   :  { %9656 = vmatpush3.bf16.msra.mxu0 %v10472_v35  ;;  %8671 = vmatprep.mubr.msk.f32.mxu0 %vm10352_vm0, %v10353_v1 }
 0x14c   :  { %9657 = vmatprep.subr.bf16.mxu0 %v10351_v0 }
 0x14e   :  { %v744_v49 = vpop.f32.mrb[4].mxu1 }
 0x14f   :  { %9659 = vmatpush3.bf16.msra.mxu0 %v10475_v36  ;;  %v745_v50 = vadd.f32 %v744_v49, %v653_v45  ;;  %v8607_v51 = vpop.f32.mrb[5].mxu1 }
 0x150   :  { %9660 = vmatprep.subr.bf16.mxu0 %v10351_v0 }
 0x152   :  { %8672 = vmatmul.mubr.f32.vlgmr.msra.gmra.mrb[0].mxu0 %v1148_v34 }
 0x153   :  { %9662 = vmatpush3.bf16.msra.mxu0 %v10481_v37  ;;  %8682 = vmatprep.mubr.msk.f32.mxu0 %vm10352_vm0, %v10353_v1 }
 0x154   :  { %9663 = vmatprep.subr.bf16.mxu0 %v10351_v0 }
 0x156   :  { %v824_v52 = vpop.f32.mrb[6].mxu1 }
 0x157   :  { %9665 = vmatpush3.bf16.msra.mxu0 %v10486_v38  ;;  %v825_v53 = vadd.f32 %v824_v52, %v745_v50  ;;  %v8618_v54 = vpop.f32.mrb[7].mxu1 }
 0x158   :  { %9666 = vmatprep.subr.bf16.mxu0 %v10351_v0 }
 0x15a   :  { %8683 = vmatmul.mubr.f32.vlgmr.msra.gmra.mrb[0].mxu0 %v1149_v40 }
 0x15b   :  { %9668 = vmatpush3.bf16.msra.mxu0 %v10457_v12  ;;  %8693 = vmatprep.mubr.msk.f32.mxu0 %vm10352_vm0, %v10353_v1 }
 0x15c   :  { %9669 = vmatprep.subr.bf16.mxu0 %v10351_v0 }
 0x15e   :  { %v901_v55 = vpop.f32.mrb[8].mxu1 }
 0x15f   :  { %9671 = vmatpush3.bf16.msra.mxu0 %v10462_v18  ;;  %v902_v56 = vadd.f32 %v901_v55, %v825_v53  ;;  %v8629_v57 = vpop.f32.mrb[9].mxu1 }
 0x160   :  { %9672 = vmatprep.subr.bf16.mxu0 %v10351_v0 }
 0x162   :  { %8694 = vmatmul.mubr.f32.vlgmr.msra.gmra.mrb[0].mxu0 %v1150_v43 }
 0x163   :  { %9674 = vmatpush3.bf16.msra.mxu0 %v10503_v42  ;;  %8704 = vmatprep.mubr.msk.f32.mxu0 %vm10352_vm0, %v10353_v1 }
 0x164   :  { %9675 = vmatprep.subr.bf16.mxu0 %v10351_v0 }
 0x166   :  { %v984_v58 = vpop.f32.mrb[10].mxu1 }
 0x167   :  { %9677 = vmatpush3.bf16.msra.mxu0 %v10509_v46  ;;  %v985_v59 = vadd.f32 %v984_v58, %v902_v56  ;;  %v8640_v60 = vpop.f32.mrb[11].mxu1 }
 0x168   :  { %9678 = vmatprep.subr.bf16.mxu0 %v10351_v0 }
 0x16a   :  { %8705 = vmatmul.mubr.f32.vlgmr.msra.gmra.mrb[0].mxu0 %v1148_v34 }
 0x16b   :  { %9680 = vmatpush3.bf16.msra.mxu0 %v10457_v12  ;;  %8715 = vmatprep.mubr.msk.f32.mxu0 %vm10352_vm0, %v10353_v1 }
 0x16c   :  { %9681 = vmatprep.subr.bf16.mxu0 %v10351_v0 }
 0x16e   :  { %v1059_v61 = vpop.f32.mrb[12].mxu1 }
 0x16f   :  { %v1060_v63 = vadd.f32 %v1059_v61, %v985_v59  ;;  %9683 = vmatpush3.bf16.msra.mxu0 %v10462_v18  ;;  %v8651_v2 = vpop.f32.mrb[13].mxu1 }
 0x170   :  { %9720 = vmatprep.subr.bf16.mxu0 %v10351_v0 }
 0x171   :  { %v1063_v3 = vadd.f32 %v1060_v63, %v567_v31  ;;  %v2547_v31 = vrot.slane %v10500_v41, 2 }
 0x172   :  { %8716 = vmatmul.mubr.f32.vlgmr.msra.gmra.mrb[0].mxu0 %v1148_v34 }
 0x173   :  { %10253 = vtanh.f32 %v1063_v3  ;;  %9722 = vmatpush3.bf16.msra.mxu0 %v10457_v12  ;;  %8792 = vmatprep.mubr.msk.f32.mxu0 %vm10352_vm0, %v10353_v1  ;;  %v2549_v34 = vsel %vm574_vm2, %v2548_v32, %v2547_v31 }
 0x174   :  { %9723 = vmatprep.subr.bf16.mxu0 %v10351_v0  ;;  %v2550_v43 = vsel %vm82_vm1, %v2549_v34, 0 }
 0x175   :  { %v2621_v45 = vand.u32 4294901760, %v2550_v43 }
 0x176   :  { %v1643_v9 = vpop.f32.mrb[14].mxu1 }
 0x177   :  { %9725 = vmatpush3.bf16.msra.mxu0 %v10462_v18  ;;  %v8728_v10 = vpop.f32.mrb[15].mxu1  ;;  %v2622_v47 = vsub.f32 %v2550_v43, %v2621_v45 }
 0x178   :  { %9726 = vmatprep.subr.bf16.mxu0 %v10351_v0 }
 0x179   :  { %v2623_v48 = vand.u32 4294901760, %v2622_v47 }
 0x17b   :  { %v2624_v49 = vsub.f32 %v2622_v47, %v2623_v48 }
 0x17d   :  { %v10254_v5 = vpop.eup %10253  ;;  %v2625_v50 = vand.u32 4294901760, %v2624_v49 }
 0x17e   :  { %v1071_v7 = vmul.f32 %v10254_v5, %v10669_v4  ;;  %v1734_v11 = vpop.f32.mrb[16].mxu1 }
 0x17f   :  { %v1735_v14 = vadd.f32 %v1734_v11, %v1643_v9  ;;  %v8739_v13 = vpop.f32.mrb[17].mxu1  ;;  %8859 = vmatmul.mubr.f32.vlgmr.msra.gmra.mrb[26].mxu1 %v2625_v50 }
 0x180   :  { %v1073_v8 = vsel %vm1072_vm3, %v1071_v7, 0.0  ;;  %9764 = vmatpush3.bf16.msra.mxu1 %v10537_v15  ;;  %8869 = vmatprep.mubr.msk.f32.mxu1 %vm10352_vm0, %v10353_v1 }
 0x181   :  { %1074 = vadd.xlane.f32.xlu0 %v1073_v8  ;;  %9765 = vmatprep.subr.bf16.mxu1 %v10351_v0 }
 0x184   :  { %9767 = vmatpush3.bf16.msra.mxu1 %v10541_v17 }
 0x185   :  { %9768 = vmatprep.subr.bf16.mxu1 %v10351_v0 }
 0x186   :  { %v1814_v16 = vpop.f32.mrb[18].mxu1 }
 0x187   :  { %v1815_v23 = vadd.f32 %v1814_v16, %v1735_v14  ;;  %v8750_v24 = vpop.f32.mrb[19].mxu1  ;;  %8870 = vmatmul.mubr.f32.vlgmr.msra.gmra.mrb[28].mxu1 %v2621_v45 }
 0x188   :  { %9770 = vmatpush3.bf16.msra.mxu1 %v10547_v19  ;;  %8880 = vmatprep.mubr.msk.f32.mxu1 %vm10352_vm0, %v10353_v1 }
 0x189   :  { %9771 = vmatprep.subr.bf16.mxu1 %v10351_v0 }
 0x18c   :  { %9773 = vmatpush3.bf16.msra.mxu1 %v10552_v20 }
 0x18d   :  { %9774 = vmatprep.subr.bf16.mxu1 %v10351_v0 }
 0x18e   :  { %v1891_v25 = vpop.f32.mrb[20].mxu1 }
 0x18f   :  { %v1892_v26 = vadd.f32 %v1891_v25, %v1815_v23  ;;  %v8761_v27 = vpop.f32.mrb[21].mxu1  ;;  %8881 = vmatmul.mubr.f32.vlgmr.msra.gmra.mrb[30].mxu1 %v2622_v47 }
 0x190   :  { %9776 = vmatpush3.bf16.msra.mxu1 %v10525_v62  ;;  %8891 = vmatprep.mubr.msk.f32.mxu1 %vm10352_vm0, %v10353_v1  ;;  %v3532_v27 = vrot.slane %v10493_v39, 2 }
 0x191   :  { %9777 = vmatprep.subr.bf16.mxu1 %v10351_v0 }
 0x194   :  { %9779 = vmatpush3.bf16.msra.mxu1 %v10530_v6 }
 0x195   :  { %9780 = vmatprep.subr.bf16.mxu1 %v10351_v0 }
 0x196   :  { %v1974_v28 = vpop.f32.mrb[22].mxu1 }
 0x197   :  { %v1975_v29 = vadd.f32 %v1974_v28, %v1892_v26  ;;  %v8772_v30 = vpop.f32.mrb[23].mxu1  ;;  %8892 = vmatmul.mubr.f32.vlgmr.msra.gmra.mrb[32].mxu1 %v2623_v48  ;;  %v3531_v26 = vrot.slane %v10500_v41, 3 }
 0x198   :  { %9782 = vmatpush3.bf16.msra.mxu1 %v10564_v21  ;;  %8902 = vmatprep.mubr.msk.f32.mxu1 %vm10352_vm0, %v10353_v1 }
 0x199   :  { %9783 = vmatprep.subr.bf16.mxu1 %v10351_v0 }
 0x19c   :  { %9785 = vmatpush3.bf16.msra.mxu1 %v10568_v22 }
 0x19d   :  { %9786 = vmatprep.subr.bf16.mxu1 %v10351_v0 }
 0x19e   :  { %v2049_v33 = vpop.f32.mrb[24].mxu1 }
 0x19f   :  { %v2050_v40 = vadd.f32 %v2049_v33, %v1975_v29  ;;  %v8783_v44 = vpop.f32.mrb[25].mxu1  ;;  %8903 = vmatmul.mubr.f32.vlgmr.msra.gmra.mrb[34].mxu1 %v2621_v45  ;;  %v3533_v29 = vsel %vm574_vm2, %v3532_v27, %v3531_v26 }
 0x1a0   :  { %9788 = vmatpush3.bf16.msra.mxu1 %v10525_v62  ;;  %8913 = vmatprep.mubr.msk.f32.mxu1 %vm10352_vm0, %v10353_v1  ;;  %v3534_v31 = vsel %vm82_vm1, %v3533_v29, 0 }
 0x1a1   :  { %9789 = vmatprep.subr.bf16.mxu1 %v10351_v0  ;;  %v3605_v33 = vand.u32 4294901760, %v3534_v31 }
 0x1a3   :  { %v3606_v34 = vsub.f32 %v3534_v31, %v3605_v33 }
 0x1a4   :  { %9791 = vmatpush3.bf16.msra.mxu1 %v10530_v6 }
 0x1a5   :  { %9828 = vmatprep.subr.bf16.mxu1 %v10351_v0 }
 0x1a7   :  { %8914 = vmatmul.mubr.f32.vlgmr.msra.gmra.mrb[36].mxu1 %v2621_v45 }
 0x1a8   :  { %9830 = vmatpush3.bf16.msra.mxu1 %v10525_v62  ;;  %8990 = vmatprep.mubr.msk.f32.mxu1 %vm10352_vm0, %v10353_v1 }
 0x1a9   :  { %9831 = vmatprep.subr.bf16.mxu1 %v10351_v0 }
 0x1ac   :  { %9833 = vmatpush3.bf16.msra.mxu1 %v10530_v6 }
 0x1ad   :  { %9834 = vmatprep.subr.bf16.mxu1 %v10351_v0 }
 0x245   :  { %v1560_v51 = vpop.f32.mrb[0].mxu0 }
 0x246   :  { %v2053_v52 = vadd.f32 %v2050_v40, %v1560_v51  ;;  %v2060_v53 = vsel %vm82_vm1, %v1560_v51, 0  ;;  %v8717_v54 = vpop.f32.mrb[1].mxu0  ;;  %v3607_v40 = vand.u32 4294901760, %v3606_v34 }
 0x247   :  { %v2131_v55 = vand.u32 4294901760, %v2060_v53 }
 0x248   :  { %10255 = vtanh.f32 %v2053_v52  ;;  %v3608_v43 = vsub.f32 %v3606_v34, %v3607_v40 }
 0x249   :  { %v2132_v56 = vsub.f32 %v2060_v53, %v2131_v55 }
 0x24a   :  { %v3609_v44 = vand.u32 4294901760, %v3608_v43 }
 0x24b   :  { %v2133_v57 = vand.u32 4294901760, %v2132_v56 }
 0x24c   :  { %8991 = vmatmul.mubr.f32.vlgmr.msra.gmra.mrb[38].mxu1 %v3609_v44 }
 0x24d   :  { %v2134_v58 = vsub.f32 %v2132_v56, %v2133_v57  ;;  %9836 = vmatpush3.bf16.msra.mxu1 %v10537_v15  ;;  %9001 = vmatprep.mubr.msk.f32.mxu1 %vm10352_vm0, %v10353_v1 }
 0x24e   :  { %9837 = vmatprep.subr.bf16.mxu1 %v10351_v0 }
 0x24f   :  { %v2135_v59 = vand.u32 4294901760, %v2134_v58 }
 0x251   :  { %8793 = vmatmul.mubr.f32.vlgmr.msra.gmra.mrb[2].mxu0 %v2135_v59  ;;  %9839 = vmatpush3.bf16.msra.mxu1 %v10541_v17 }
 0x252   :  { %v10256_v60 = vpop.eup %10255  ;;  %9728 = vmatpush3.bf16.msra.mxu0 %v10472_v35  ;;  %8803 = vmatprep.mubr.msk.f32.mxu0 %vm10352_vm0, %v10353_v1  ;;  %v2627_v2 = vpop.f32.mrb[26].mxu1 }
 0x253   :  { %9729 = vmatprep.subr.bf16.mxu0 %v10351_v0  ;;  %v2055_v61 = vmul.f32 %v10256_v60, %v10669_v4  ;;  %v8860_v3 = vpop.f32.mrb[27].mxu1  ;;  %9840 = vmatprep.subr.bf16.mxu1 %v10351_v0 }
 0x254   :  { %9002 = vmatmul.mubr.f32.vlgmr.msra.gmra.mrb[40].mxu1 %v3605_v33 }
 0x255   :  { %v2056_v63 = vsel %vm1072_vm3, %v2055_v61, 0.0  ;;  %9842 = vmatpush3.bf16.msra.mxu1 %v10547_v19  ;;  %9012 = vmatprep.mubr.msk.f32.mxu1 %vm10352_vm0, %v10353_v1 }
 0x256   :  { %9731 = vmatpush3.bf16.msra.mxu0 %v10475_v36  ;;  %2057 = vadd.xlane.f32.xlu0 %v2056_v63 }
 0x257   :  { %9732 = vmatprep.subr.bf16.mxu0 %v10351_v0  ;;  %9843 = vmatprep.subr.bf16.mxu1 %v10351_v0 }
 0x259   :  { %8804 = vmatmul.mubr.f32.vlgmr.msra.gmra.mrb[2].mxu0 %v2131_v55  ;;  %9845 = vmatpush3.bf16.msra.mxu1 %v10552_v20 }
 0x25a   :  { %9734 = vmatpush3.bf16.msra.mxu0 %v10481_v37  ;;  %8814 = vmatprep.mubr.msk.f32.mxu0 %vm10352_vm0, %v10353_v1  ;;  %v2718_v5 = vpop.f32.mrb[28].mxu1 }
 0x25b   :  { %9735 = vmatprep.subr.bf16.mxu0 %v10351_v0  ;;  %v2719_v7 = vadd.f32 %v2718_v5, %v2627_v2  ;;  %v8871_v8 = vpop.f32.mrb[29].mxu1  ;;  %9846 = vmatprep.subr.bf16.mxu1 %v10351_v0 }
 0x25c   :  { %9013 = vmatmul.mubr.f32.vlgmr.msra.gmra.mrb[42].mxu1 %v3606_v34 }
 0x25d   :  { %9848 = vmatpush3.bf16.msra.mxu1 %v10525_v62  ;;  %9023 = vmatprep.mubr.msk.f32.mxu1 %vm10352_vm0, %v10353_v1 }
 0x25e   :  { %9737 = vmatpush3.bf16.msra.mxu0 %v10486_v38  ;;  %9849 = vmatprep.subr.bf16.mxu1 %v10351_v0 }
 0x25f   :  { %9738 = vmatprep.subr.bf16.mxu0 %v10351_v0 }
 0x261   :  { %8815 = vmatmul.mubr.f32.vlgmr.msra.gmra.mrb[2].mxu0 %v2132_v56  ;;  %9851 = vmatpush3.bf16.msra.mxu1 %v10530_v6 }
 0x262   :  { %9740 = vmatpush3.bf16.msra.mxu0 %v10457_v12  ;;  %8825 = vmatprep.mubr.msk.f32.mxu0 %vm10352_vm0, %v10353_v1  ;;  %v2798_v9 = vpop.f32.mrb[30].mxu1 }
 0x263   :  { %9741 = vmatprep.subr.bf16.mxu0 %v10351_v0  ;;  %v2799_v10 = vadd.f32 %v2798_v9, %v2719_v7  ;;  %v8882_v11 = vpop.f32.mrb[31].mxu1  ;;  %9852 = vmatprep.subr.bf16.mxu1 %v10351_v0 }
 0x264   :  { %9024 = vmatmul.mubr.f32.vlgmr.msra.gmra.mrb[44].mxu1 %v3607_v40 }
 0x265   :  { %9854 = vmatpush3.bf16.msra.mxu1 %v10564_v21  ;;  %9034 = vmatprep.mubr.msk.f32.mxu1 %vm10352_vm0, %v10353_v1 }
 0x266   :  { %9743 = vmatpush3.bf16.msra.mxu0 %v10462_v18  ;;  %9855 = vmatprep.subr.bf16.mxu1 %v10351_v0 }
 0x267   :  { %9744 = vmatprep.subr.bf16.mxu0 %v10351_v0 }
 0x269   :  { %8826 = vmatmul.mubr.f32.vlgmr.msra.gmra.mrb[2].mxu0 %v2133_v57  ;;  %9857 = vmatpush3.bf16.msra.mxu1 %v10568_v22 }
 0x26a   :  { %9746 = vmatpush3.bf16.msra.mxu0 %v10503_v42  ;;  %8836 = vmatprep.mubr.msk.f32.mxu0 %vm10352_vm0, %v10353_v1  ;;  %v2875_v14 = vpop.f32.mrb[32].mxu1 }
 0x26b   :  { %9747 = vmatprep.subr.bf16.mxu0 %v10351_v0  ;;  %v2876_v13 = vadd.f32 %v2875_v14, %v2799_v10  ;;  %v8893_v16 = vpop.f32.mrb[33].mxu1  ;;  %9858 = vmatprep.subr.bf16.mxu1 %v10351_v0 }
 0x26c   :  { %9035 = vmatmul.mubr.f32.vlgmr.msra.gmra.mrb[46].mxu1 %v3605_v33  ;;  %v4516_v16 = vrot.slane %v10493_v39, 3 }
 0x26d   :  { %9860 = vmatpush3.bf16.msra.mxu1 %v10525_v62  ;;  %9045 = vmatprep.mubr.msk.f32.mxu1 %vm10352_vm0, %v10353_v1 }
 0x26e   :  { %9749 = vmatpush3.bf16.msra.mxu0 %v10509_v46  ;;  %9861 = vmatprep.subr.bf16.mxu1 %v10351_v0 }
 0x26f   :  { %9750 = vmatprep.subr.bf16.mxu0 %v10351_v0 }
 0x271   :  { %8837 = vmatmul.mubr.f32.vlgmr.msra.gmra.mrb[2].mxu0 %v2131_v55  ;;  %9863 = vmatpush3.bf16.msra.mxu1 %v10530_v6 }
 0x272   :  { %9752 = vmatpush3.bf16.msra.mxu0 %v10457_v12  ;;  %8847 = vmatprep.mubr.msk.f32.mxu0 %vm10352_vm0, %v10353_v1  ;;  %v2958_v23 = vpop.f32.mrb[34].mxu1 }
 0x273   :  { %9753 = vmatprep.subr.bf16.mxu0 %v10351_v0  ;;  %v2959_v24 = vadd.f32 %v2958_v23, %v2876_v13  ;;  %v8904_v25 = vpop.f32.mrb[35].mxu1  ;;  %9900 = vmatprep.subr.bf16.mxu1 %v10351_v0  ;;  %v4515_v13 = vrot.slane %v10500_v41, 4 }
 0x274   :  { %9046 = vmatmul.mubr.f32.vlgmr.msra.gmra.mrb[48].mxu1 %v3605_v33 }
 0x275   :  { %9902 = vmatpush3.bf16.msra.mxu1 %v10525_v62  ;;  %9122 = vmatprep.mubr.msk.f32.mxu1 %vm10352_vm0, %v10353_v1 }
 0x276   :  { %9755 = vmatpush3.bf16.msra.mxu0 %v10462_v18  ;;  %9903 = vmatprep.subr.bf16.mxu1 %v10351_v0 }
 0x277   :  { %9792 = vmatprep.subr.bf16.mxu0 %v10351_v0 }
 0x279   :  { %8848 = vmatmul.mubr.f32.vlgmr.msra.gmra.mrb[2].mxu0 %v2131_v55  ;;  %9905 = vmatpush3.bf16.msra.mxu1 %v10530_v6 }
 0x27a   :  { %9794 = vmatpush3.bf16.msra.mxu0 %v10457_v12  ;;  %8924 = vmatprep.mubr.msk.f32.mxu0 %vm10352_vm0, %v10353_v1  ;;  %v3033_v28 = vpop.f32.mrb[36].mxu1 }
 0x27b   :  { %9795 = vmatprep.subr.bf16.mxu0 %v10351_v0  ;;  %v3034_v30 = vadd.f32 %v3033_v28, %v2959_v24  ;;  %v8915_v32 = vpop.f32.mrb[37].mxu1  ;;  %9906 = vmatprep.subr.bf16.mxu1 %v10351_v0  ;;  %v4517_v24 = vsel %vm574_vm2, %v4516_v16, %v4515_v13 }
 0x27c   :  { %v4518_v26 = vsel %vm82_vm1, %v4517_v24, 0 }
 0x27d   :  { %v4589_v28 = vand.u32 4294901760, %v4518_v26 }
 0x27e   :  { %9797 = vmatpush3.bf16.msra.mxu0 %v10462_v18 }
 0x27f   :  { %9798 = vmatprep.subr.bf16.mxu0 %v10351_v0  ;;  %v4590_v29 = vsub.f32 %v4518_v26, %v4589_v28 }
 0x31f   :  { %v3611_v58 = vpop.f32.mrb[38].mxu1 }
 0x320   :  { %v8992_v59 = vpop.f32.mrb[39].mxu1 }
 0x327   :  { %v3702_v60 = vpop.f32.mrb[40].mxu1 }
 0x328   :  { %v3703_v61 = vadd.f32 %v3702_v60, %v3611_v58  ;;  %v9003_v63 = vpop.f32.mrb[41].mxu1 }
 0x32f   :  { %v3782_v2 = vpop.f32.mrb[42].mxu1 }
 0x330   :  { %v3783_v3 = vadd.f32 %v3782_v2, %v3703_v61  ;;  %v9014_v5 = vpop.f32.mrb[43].mxu1 }
 0x331   :  { %v10910_v5 = vld [vmem:[#allocation3] sm:$0xff] }
 0x337   :  { %v3859_v7 = vpop.f32.mrb[44].mxu1 }
 0x338   :  { %v3860_v8 = vadd.f32 %v3859_v7, %v3783_v3  ;;  %v9025_v9 = vpop.f32.mrb[45].mxu1  ;;  %v5499_v7 = vrot.slane %v10910_v5, 5 }
 0x33f   :  { %v3942_v10 = vpop.f32.mrb[46].mxu1 }
 0x340   :  { %v3943_v11 = vadd.f32 %v3942_v10, %v3860_v8  ;;  %v9036_v14 = vpop.f32.mrb[47].mxu1  ;;  %v10913_v8 = vld [vmem:[#allocation3 + $0x8] sm:$0xff] }
 0x341   :  { %v5500_v9 = vrot.slane %v10913_v8, 4 }
 0x347   :  { %v4017_v23 = vpop.f32.mrb[48].mxu1 }
 0x348   :  { %v4018_v25 = vadd.f32 %v4017_v23, %v3943_v11  ;;  %v9047_v27 = vpop.f32.mrb[49].mxu1  ;;  %v5501_v11 = vsel %vm574_vm2, %v5500_v9, %v5499_v7 }
 0x349   :  { %v5502_v13 = vsel %vm82_vm1, %v5501_v11, 0 }
 0x34a   :  { %v5573_v23 = vand.u32 4294901760, %v5502_v13 }
 0x34c   :  { %v2543_v45 = vpop.f32.mrb[2].mxu0  ;;  %v5574_v24 = vsub.f32 %v5502_v13, %v5573_v23 }
 0x34d   :  { %v3037_v47 = vadd.f32 %v3034_v30, %v2543_v45  ;;  %v3044_v48 = vsel %vm82_vm1, %v2543_v45, 0  ;;  %v8849_v49 = vpop.f32.mrb[3].mxu0  ;;  %v4591_v30 = vand.u32 4294901760, %v4590_v29 }
 0x34e   :  { %v3115_v50 = vand.u32 4294901760, %v3044_v48 }
 0x34f   :  { %10257 = vtanh.f32 %v3037_v47  ;;  %v4592_v31 = vsub.f32 %v4590_v29, %v4591_v30 }
 0x350   :  { %v3116_v51 = vsub.f32 %v3044_v48, %v3115_v50 }
 0x351   :  { %v4593_v32 = vand.u32 4294901760, %v4592_v31 }
 0x352   :  { %v3117_v52 = vand.u32 4294901760, %v3116_v51 }
 0x353   :  { %9123 = vmatmul.mubr.f32.vlgmr.msra.gmra.mrb[50].mxu1 %v4593_v32 }
 0x354   :  { %v3118_v53 = vsub.f32 %v3116_v51, %v3117_v52  ;;  %9908 = vmatpush3.bf16.msra.mxu1 %v10537_v15  ;;  %9133 = vmatprep.mubr.msk.f32.mxu1 %vm10352_vm0, %v10353_v1 }
 0x355   :  { %9909 = vmatprep.subr.bf16.mxu1 %v10351_v0 }
 0x356   :  { %v3119_v54 = vand.u32 4294901760, %v3118_v53 }
 0x358   :  { %8925 = vmatmul.mubr.f32.vlgmr.msra.gmra.mrb[4].mxu0 %v3119_v54  ;;  %9911 = vmatpush3.bf16.msra.mxu1 %v10541_v17 }
 0x359   :  { %v10258_v55 = vpop.eup %10257  ;;  %9800 = vmatpush3.bf16.msra.mxu0 %v10472_v35  ;;  %8935 = vmatprep.mubr.msk.f32.mxu0 %vm10352_vm0, %v10353_v1 }
 0x35a   :  { %9801 = vmatprep.subr.bf16.mxu0 %v10351_v0  ;;  %v3039_v56 = vmul.f32 %v10258_v55, %v10669_v4  ;;  %9912 = vmatprep.subr.bf16.mxu1 %v10351_v0 }
 0x35b   :  { %9134 = vmatmul.mubr.f32.vlgmr.msra.gmra.mrb[52].mxu1 %v4589_v28 }
 0x35c   :  { %v3040_v57 = vsel %vm1072_vm3, %v3039_v56, 0.0  ;;  %9914 = vmatpush3.bf16.msra.mxu1 %v10547_v19  ;;  %9144 = vmatprep.mubr.msk.f32.mxu1 %vm10352_vm0, %v10353_v1 }
 0x35d   :  { %9803 = vmatpush3.bf16.msra.mxu0 %v10475_v36  ;;  %3041 = vadd.xlane.f32.xlu1 %v3040_v57 }
 0x35e   :  { %9804 = vmatprep.subr.bf16.mxu0 %v10351_v0  ;;  %9915 = vmatprep.subr.bf16.mxu1 %v10351_v0 }
 0x360   :  { %8936 = vmatmul.mubr.f32.vlgmr.msra.gmra.mrb[4].mxu0 %v3115_v50  ;;  %9917 = vmatpush3.bf16.msra.mxu1 %v10552_v20 }
 0x361   :  { %9806 = vmatpush3.bf16.msra.mxu0 %v10481_v37  ;;  %8946 = vmatprep.mubr.msk.f32.mxu0 %vm10352_vm0, %v10353_v1 }
 0x362   :  { %9807 = vmatprep.subr.bf16.mxu0 %v10351_v0  ;;  %9918 = vmatprep.subr.bf16.mxu1 %v10351_v0 }
 0x363   :  { %9145 = vmatmul.mubr.f32.vlgmr.msra.gmra.mrb[54].mxu1 %v4590_v29 }
 0x364   :  { %9920 = vmatpush3.bf16.msra.mxu1 %v10525_v62  ;;  %9155 = vmatprep.mubr.msk.f32.mxu1 %vm10352_vm0, %v10353_v1 }
 0x365   :  { %9809 = vmatpush3.bf16.msra.mxu0 %v10486_v38  ;;  %9921 = vmatprep.subr.bf16.mxu1 %v10351_v0 }
 0x366   :  { %9810 = vmatprep.subr.bf16.mxu0 %v10351_v0 }
 0x368   :  { %8947 = vmatmul.mubr.f32.vlgmr.msra.gmra.mrb[4].mxu0 %v3116_v51  ;;  %9923 = vmatpush3.bf16.msra.mxu1 %v10530_v6 }
 0x369   :  { %9812 = vmatpush3.bf16.msra.mxu0 %v10457_v12  ;;  %8957 = vmatprep.mubr.msk.f32.mxu0 %vm10352_vm0, %v10353_v1 }
 0x36a   :  { %9813 = vmatprep.subr.bf16.mxu0 %v10351_v0  ;;  %9924 = vmatprep.subr.bf16.mxu1 %v10351_v0 }
 0x36b   :  { %9156 = vmatmul.mubr.f32.vlgmr.msra.gmra.mrb[56].mxu1 %v4591_v30 }
 0x36c   :  { %9926 = vmatpush3.bf16.msra.mxu1 %v10564_v21  ;;  %9166 = vmatprep.mubr.msk.f32.mxu1 %vm10352_vm0, %v10353_v1 }
 0x36d   :  { %9815 = vmatpush3.bf16.msra.mxu0 %v10462_v18  ;;  %9927 = vmatprep.subr.bf16.mxu1 %v10351_v0 }
 0x36e   :  { %9816 = vmatprep.subr.bf16.mxu0 %v10351_v0 }
 0x370   :  { %8958 = vmatmul.mubr.f32.vlgmr.msra.gmra.mrb[4].mxu0 %v3117_v52  ;;  %9929 = vmatpush3.bf16.msra.mxu1 %v10568_v22 }
 0x371   :  { %9818 = vmatpush3.bf16.msra.mxu0 %v10503_v42  ;;  %8968 = vmatprep.mubr.msk.f32.mxu0 %vm10352_vm0, %v10353_v1 }
 0x372   :  { %9819 = vmatprep.subr.bf16.mxu0 %v10351_v0  ;;  %9930 = vmatprep.subr.bf16.mxu1 %v10351_v0 }
 0x373   :  { %9167 = vmatmul.mubr.f32.vlgmr.msra.gmra.mrb[58].mxu1 %v4589_v28 }
 0x374   :  { %9932 = vmatpush3.bf16.msra.mxu1 %v10525_v62  ;;  %9177 = vmatprep.mubr.msk.f32.mxu1 %vm10352_vm0, %v10353_v1 }
 0x375   :  { %9821 = vmatpush3.bf16.msra.mxu0 %v10509_v46  ;;  %9933 = vmatprep.subr.bf16.mxu1 %v10351_v0 }
 0x376   :  { %9822 = vmatprep.subr.bf16.mxu0 %v10351_v0 }
 0x378   :  { %8969 = vmatmul.mubr.f32.vlgmr.msra.gmra.mrb[4].mxu0 %v3115_v50  ;;  %9935 = vmatpush3.bf16.msra.mxu1 %v10530_v6 }
 0x379   :  { %9824 = vmatpush3.bf16.msra.mxu0 %v10457_v12  ;;  %8979 = vmatprep.mubr.msk.f32.mxu0 %vm10352_vm0, %v10353_v1 }
 0x37a   :  { %9825 = vmatprep.subr.bf16.mxu0 %v10351_v0  ;;  %9972 = vmatprep.subr.bf16.mxu1 %v10351_v0 }
 0x37b   :  { %9178 = vmatmul.mubr.f32.vlgmr.msra.gmra.mrb[60].mxu1 %v4589_v28 }
 0x37c   :  { %9974 = vmatpush3.bf16.msra.mxu1 %v10525_v62  ;;  %9254 = vmatprep.mubr.msk.f32.mxu1 %vm10352_vm0, %v10353_v1 }
 0x37d   :  { %9827 = vmatpush3.bf16.msra.mxu0 %v10462_v18  ;;  %9975 = vmatprep.subr.bf16.mxu1 %v10351_v0 }
 0x37e   :  { %9864 = vmatprep.subr.bf16.mxu0 %v10351_v0 }
 0x380   :  { %8980 = vmatmul.mubr.f32.vlgmr.msra.gmra.mrb[4].mxu0 %v3115_v50  ;;  %9977 = vmatpush3.bf16.msra.mxu1 %v10530_v6 }
 0x381   :  { %9866 = vmatpush3.bf16.msra.mxu0 %v10457_v12  ;;  %9056 = vmatprep.mubr.msk.f32.mxu0 %vm10352_vm0, %v10353_v1 }
 0x382   :  { %9867 = vmatprep.subr.bf16.mxu0 %v10351_v0  ;;  %9978 = vmatprep.subr.bf16.mxu1 %v10351_v0 }
 0x385   :  { %9869 = vmatpush3.bf16.msra.mxu0 %v10462_v18 }
 0x386   :  { %9870 = vmatprep.subr.bf16.mxu0 %v10351_v0 }
 0x426   :  { %v4595_v51 = vpop.f32.mrb[50].mxu1 }
 0x427   :  { %v9124_v52 = vpop.f32.mrb[51].mxu1 }
 0x42e   :  { %v4686_v53 = vpop.f32.mrb[52].mxu1 }
 0x42f   :  { %v4687_v54 = vadd.f32 %v4686_v53, %v4595_v51  ;;  %v9135_v55 = vpop.f32.mrb[53].mxu1 }
 0x436   :  { %v4766_v56 = vpop.f32.mrb[54].mxu1 }
 0x437   :  { %v4767_v57 = vadd.f32 %v4766_v56, %v4687_v54  ;;  %v9146_v58 = vpop.f32.mrb[55].mxu1 }
 0x43e   :  { %v4843_v59 = vpop.f32.mrb[56].mxu1 }
 0x43f   :  { %v4844_v60 = vadd.f32 %v4843_v59, %v4767_v57  ;;  %v9157_v61 = vpop.f32.mrb[57].mxu1  ;;  %v6483_v59 = vrot.slane %v10910_v5, 6 }
 0x446   :  { %v4926_v63 = vpop.f32.mrb[58].mxu1 }
 0x447   :  { %v4927_v2 = vadd.f32 %v4926_v63, %v4844_v60  ;;  %v9168_v3 = vpop.f32.mrb[59].mxu1  ;;  %v6484_v60 = vrot.slane %v10913_v8, 5 }
 0x449   :  { %v6485_v63 = vsel %vm574_vm2, %v6484_v60, %v6483_v59 }
 0x44a   :  { %v6486_v3 = vsel %vm82_vm1, %v6485_v63, 0 }
 0x44b   :  { %v6557_v9 = vand.u32 4294901760, %v6486_v3 }
 0x44e   :  { %v5001_v10 = vpop.f32.mrb[60].mxu1 }
 0x44f   :  { %v5002_v14 = vadd.f32 %v5001_v10, %v4927_v2  ;;  %v9179_v16 = vpop.f32.mrb[61].mxu1  ;;  %v6558_v10 = vsub.f32 %v6486_v3, %v6557_v9 }
 0x451   :  { %v6559_v11 = vand.u32 4294901760, %v6558_v10 }
 0x453   :  { %v3527_v39 = vpop.f32.mrb[4].mxu0 }
 0x454   :  { %v4021_v41 = vadd.f32 %v4018_v25, %v3527_v39  ;;  %v4028_v33 = vsel %vm82_vm1, %v3527_v39, 0  ;;  %v8981_v34 = vpop.f32.mrb[5].mxu0  ;;  %v5575_v25 = vand.u32 4294901760, %v5574_v24 }
 0x455   :  { %v4099_v40 = vand.u32 4294901760, %v4028_v33 }
 0x456   :  { %10259 = vtanh.f32 %v4021_v41  ;;  %v5576_v26 = vsub.f32 %v5574_v24, %v5575_v25 }
 0x457   :  { %v4100_v43 = vsub.f32 %v4028_v33, %v4099_v40 }
 0x458   :  { %v5577_v27 = vand.u32 4294901760, %v5576_v26 }
 0x459   :  { %v4101_v44 = vand.u32 4294901760, %v4100_v43 }
 0x45a   :  { %9255 = vmatmul.mubr.f32.vlgmr.msra.gmra.mrb[62].mxu1 %v5577_v27 }
 0x45b   :  { %v4102_v45 = vsub.f32 %v4100_v43, %v4101_v44  ;;  %9980 = vmatpush3.bf16.msra.mxu1 %v10537_v15  ;;  %9265 = vmatprep.mubr.msk.f32.mxu1 %vm10352_vm0, %v10353_v1 }
 0x45c   :  { %9981 = vmatprep.subr.bf16.mxu1 %v10351_v0 }
 0x45d   :  { %v4103_v47 = vand.u32 4294901760, %v4102_v45 }
 0x45f   :  { %9057 = vmatmul.mubr.f32.vlgmr.msra.gmra.mrb[6].mxu0 %v4103_v47  ;;  %9983 = vmatpush3.bf16.msra.mxu1 %v10541_v17 }
 0x460   :  { %v10260_v48 = vpop.eup %10259  ;;  %9872 = vmatpush3.bf16.msra.mxu0 %v10472_v35  ;;  %9067 = vmatprep.mubr.msk.f32.mxu0 %vm10352_vm0, %v10353_v1 }
 0x461   :  { %9873 = vmatprep.subr.bf16.mxu0 %v10351_v0  ;;  %v4023_v49 = vmul.f32 %v10260_v48, %v10669_v4  ;;  %9984 = vmatprep.subr.bf16.mxu1 %v10351_v0 }
 0x462   :  { %9266 = vmatmul.mubr.f32.vlgmr.msra.gmra.mrb[64].mxu1 %v5573_v23 }
 0x463   :  { %v4024_v50 = vsel %vm1072_vm3, %v4023_v49, 0.0  ;;  %9986 = vmatpush3.bf16.msra.mxu1 %v10547_v19  ;;  %9276 = vmatprep.mubr.msk.f32.mxu1 %vm10352_vm0, %v10353_v1 }
 0x464   :  { %9875 = vmatpush3.bf16.msra.mxu0 %v10475_v36  ;;  %4025 = vadd.xlane.f32.xlu1 %v4024_v50 }
 0x465   :  { %9876 = vmatprep.subr.bf16.mxu0 %v10351_v0  ;;  %9987 = vmatprep.subr.bf16.mxu1 %v10351_v0 }
 0x467   :  { %9068 = vmatmul.mubr.f32.vlgmr.msra.gmra.mrb[6].mxu0 %v4099_v40  ;;  %9989 = vmatpush3.bf16.msra.mxu1 %v10552_v20 }
 0x468   :  { %9878 = vmatpush3.bf16.msra.mxu0 %v10481_v37  ;;  %9078 = vmatprep.mubr.msk.f32.mxu0 %vm10352_vm0, %v10353_v1 }
 0x469   :  { %9879 = vmatprep.subr.bf16.mxu0 %v10351_v0  ;;  %9990 = vmatprep.subr.bf16.mxu1 %v10351_v0 }
 0x46a   :  { %9277 = vmatmul.mubr.f32.vlgmr.msra.gmra.mrb[66].mxu1 %v5574_v24 }
 0x46b   :  { %9992 = vmatpush3.bf16.msra.mxu1 %v10525_v62  ;;  %9287 = vmatprep.mubr.msk.f32.mxu1 %vm10352_vm0, %v10353_v1 }
 0x46c   :  { %9881 = vmatpush3.bf16.msra.mxu0 %v10486_v38  ;;  %9993 = vmatprep.subr.bf16.mxu1 %v10351_v0 }
 0x46d   :  { %9882 = vmatprep.subr.bf16.mxu0 %v10351_v0 }
 0x46f   :  { %9079 = vmatmul.mubr.f32.vlgmr.msra.gmra.mrb[6].mxu0 %v4100_v43  ;;  %9995 = vmatpush3.bf16.msra.mxu1 %v10530_v6 }
 0x470   :  { %9884 = vmatpush3.bf16.msra.mxu0 %v10457_v12  ;;  %9089 = vmatprep.mubr.msk.f32.mxu0 %vm10352_vm0, %v10353_v1 }
 0x471   :  { %9885 = vmatprep.subr.bf16.mxu0 %v10351_v0  ;;  %9996 = vmatprep.subr.bf16.mxu1 %v10351_v0 }
 0x472   :  { %9288 = vmatmul.mubr.f32.vlgmr.msra.gmra.mrb[68].mxu1 %v5575_v25 }
 0x473   :  { %9998 = vmatpush3.bf16.msra.mxu1 %v10564_v21  ;;  %9298 = vmatprep.mubr.msk.f32.mxu1 %vm10352_vm0, %v10353_v1 }
 0x474   :  { %9887 = vmatpush3.bf16.msra.mxu0 %v10462_v18  ;;  %9999 = vmatprep.subr.bf16.mxu1 %v10351_v0 }
 0x475   :  { %9888 = vmatprep.subr.bf16.mxu0 %v10351_v0 }
 0x477   :  { %9090 = vmatmul.mubr.f32.vlgmr.msra.gmra.mrb[6].mxu0 %v4101_v44  ;;  %10001 = vmatpush3.bf16.msra.mxu1 %v10568_v22 }
 0x478   :  { %9890 = vmatpush3.bf16.msra.mxu0 %v10503_v42  ;;  %9100 = vmatprep.mubr.msk.f32.mxu0 %vm10352_vm0, %v10353_v1 }
 0x479   :  { %9891 = vmatprep.subr.bf16.mxu0 %v10351_v0  ;;  %10002 = vmatprep.subr.bf16.mxu1 %v10351_v0 }
 0x47a   :  { %9299 = vmatmul.mubr.f32.vlgmr.msra.gmra.mrb[70].mxu1 %v5573_v23 }
 0x47b   :  { %10004 = vmatpush3.bf16.msra.mxu1 %v10525_v62  ;;  %9309 = vmatprep.mubr.msk.f32.mxu1 %vm10352_vm0, %v10353_v1 }
 0x47c   :  { %9893 = vmatpush3.bf16.msra.mxu0 %v10509_v46  ;;  %10005 = vmatprep.subr.bf16.mxu1 %v10351_v0 }
 0x47d   :  { %9894 = vmatprep.subr.bf16.mxu0 %v10351_v0 }
 0x47f   :  { %9101 = vmatmul.mubr.f32.vlgmr.msra.gmra.mrb[6].mxu0 %v4099_v40  ;;  %10007 = vmatpush3.bf16.msra.mxu1 %v10530_v6 }
 0x480   :  { %9896 = vmatpush3.bf16.msra.mxu0 %v10457_v12  ;;  %9111 = vmatprep.mubr.msk.f32.mxu0 %vm10352_vm0, %v10353_v1 }
 0x481   :  { %9897 = vmatprep.subr.bf16.mxu0 %v10351_v0  ;;  %10044 = vmatprep.subr.bf16.mxu1 %v10351_v0 }
 0x482   :  { %9310 = vmatmul.mubr.f32.vlgmr.msra.gmra.mrb[72].mxu1 %v5573_v23 }
 0x483   :  { %10046 = vmatpush3.bf16.msra.mxu1 %v10525_v62  ;;  %9386 = vmatprep.mubr.msk.f32.mxu1 %vm10352_vm0, %v10353_v1 }
 0x484   :  { %9899 = vmatpush3.bf16.msra.mxu0 %v10462_v18  ;;  %10047 = vmatprep.subr.bf16.mxu1 %v10351_v0 }
 0x485   :  { %9936 = vmatprep.subr.bf16.mxu0 %v10351_v0 }
 0x487   :  { %9112 = vmatmul.mubr.f32.vlgmr.msra.gmra.mrb[6].mxu0 %v4099_v40  ;;  %10049 = vmatpush3.bf16.msra.mxu1 %v10530_v6 }
 0x488   :  { %9938 = vmatpush3.bf16.msra.mxu0 %v10457_v12  ;;  %9188 = vmatprep.mubr.msk.f32.mxu0 %vm10352_vm0, %v10353_v1 }
 0x489   :  { %9939 = vmatprep.subr.bf16.mxu0 %v10351_v0  ;;  %10050 = vmatprep.subr.bf16.mxu1 %v10351_v0 }
 0x48c   :  { %9941 = vmatpush3.bf16.msra.mxu0 %v10462_v18 }
 0x48d   :  { %9942 = vmatprep.subr.bf16.mxu0 %v10351_v0 }
 0x55a   :  { %v4511_v28 = vpop.f32.mrb[6].mxu0 }
 0x55b   :  { %v5005_v29 = vadd.f32 %v5002_v14, %v4511_v28  ;;  %v5012_v30 = vsel %vm82_vm1, %v4511_v28, 0  ;;  %v9113_v31 = vpop.f32.mrb[7].mxu0  ;;  %v6560_v14 = vsub.f32 %v6558_v10, %v6559_v11 }
 0x55c   :  { %v5083_v32 = vand.u32 4294901760, %v5012_v30 }
 0x55d   :  { %10261 = vtanh.f32 %v5005_v29  ;;  %v6561_v13 = vand.u32 4294901760, %v6560_v14 }
 0x55e   :  { %v5084_v39 = vsub.f32 %v5012_v30, %v5083_v32 }
 0x55f   :  { %9387 = vmatmul.mubr.f32.vlgmr.msra.gmra.mrb[74].mxu1 %v6561_v13  ;;  %v3042_v13 = vpop.xlane.xlu1 %3041 }
 0x560   :  { %v5085_v41 = vand.u32 4294901760, %v5084_v39  ;;  %10052 = vmatpush3.bf16.msra.mxu1 %v10537_v15  ;;  %9397 = vmatprep.mubr.msk.f32.mxu1 %vm10352_vm0, %v10353_v1 }
 0x561   :  { %10053 = vmatprep.subr.bf16.mxu1 %v10351_v0 }
 0x562   :  { %v5086_v33 = vsub.f32 %v5084_v39, %v5085_v41 }
 0x564   :  { %v5087_v34 = vand.u32 4294901760, %v5086_v33  ;;  %10055 = vmatpush3.bf16.msra.mxu1 %v10541_v17  ;;  %v6979_v33 = vrot.slane %v10910_v5, 7 }
 0x565   :  { %10056 = vmatprep.subr.bf16.mxu1 %v10351_v0 }
 0x566   :  { %9189 = vmatmul.mubr.f32.vlgmr.msra.gmra.mrb[8].mxu0 %v5087_v34  ;;  %v6980_v34 = vrot.slane %v10913_v8, 6 }
 0x567   :  { %v10262_v40 = vpop.eup %10261  ;;  %9944 = vmatpush3.bf16.msra.mxu0 %v10472_v35  ;;  %9199 = vmatprep.mubr.msk.f32.mxu0 %vm10352_vm0, %v10353_v1 }
 0x568   :  { %9945 = vmatprep.subr.bf16.mxu0 %v10351_v0  ;;  %v5007_v43 = vmul.f32 %v10262_v40, %v10669_v4  ;;  %v5579_v4 = vpop.f32.mrb[62].mxu1  ;;  %9398 = vmatmul.mubr.f32.vlgmr.msra.gmra.mrb[76].mxu1 %v6557_v9  ;;  %v6981_v40 = vsel %vm574_vm2, %v6980_v34, %v6979_v33 }
 0x569   :  { %v9256_v45 = vpop.f32.mrb[63].mxu1  ;;  %10058 = vmatpush3.bf16.msra.mxu1 %v10547_v19  ;;  %9408 = vmatprep.mubr.msk.f32.mxu1 %vm10352_vm0, %v10353_v1 }
 0x56a   :  { %v5008_v44 = vsel %vm1072_vm3, %v5007_v43, 0.0  ;;  %v5670_v47 = vpop.f32.mrb[64].mxu1  ;;  %10059 = vmatprep.subr.bf16.mxu1 %v10351_v0  ;;  %v6982_v43 = vsel %vm82_vm1, %v6981_v40, 0 }
 0x56b   :  { %9947 = vmatpush3.bf16.msra.mxu0 %v10475_v36  ;;  %5009 = vadd.xlane.f32.xlu0 %v5008_v44  ;;  %v5671_v48 = vadd.f32 %v5670_v47, %v5579_v4  ;;  %v9267_v49 = vpop.f32.mrb[65].mxu1  ;;  %v7053_v44 = vand.u32 4294901760, %v6982_v43 }
 0x56c   :  { %9948 = vmatprep.subr.bf16.mxu0 %v10351_v0  ;;  %v5750_v50 = vpop.f32.mrb[66].mxu1 }
 0x56d   :  { %v5751_v51 = vadd.f32 %v5750_v50, %v5671_v48  ;;  %v9278_v52 = vpop.f32.mrb[67].mxu1  ;;  %10061 = vmatpush3.bf16.msra.mxu1 %v10552_v20  ;;  %v7054_v4 = vsub.f32 %v6982_v43, %v7053_v44 }
 0x56e   :  { %9200 = vmatmul.mubr.f32.vlgmr.msra.gmra.mrb[8].mxu0 %v5083_v32  ;;  %v5827_v53 = vpop.f32.mrb[68].mxu1  ;;  %10062 = vmatprep.subr.bf16.mxu1 %v10351_v0 }
 0x56f   :  { %9950 = vmatpush3.bf16.msra.mxu0 %v10481_v37  ;;  %9210 = vmatprep.mubr.msk.f32.mxu0 %vm10352_vm0, %v10353_v1  ;;  %v5828_v54 = vadd.f32 %v5827_v53, %v5751_v51  ;;  %v9289_v55 = vpop.f32.mrb[69].mxu1  ;;  %v7055_v45 = vand.u32 4294901760, %v7054_v4 }
 0x570   :  { %9951 = vmatprep.subr.bf16.mxu0 %v10351_v0  ;;  %v5910_v56 = vpop.f32.mrb[70].mxu1  ;;  %9409 = vmatmul.mubr.f32.vlgmr.msra.gmra.mrb[78].mxu1 %v6558_v10 }
 0x571   :  { %v5911_v57 = vadd.f32 %v5910_v56, %v5828_v54  ;;  %v9300_v58 = vpop.f32.mrb[71].mxu1  ;;  %10064 = vmatpush3.bf16.msra.mxu1 %v10525_v62  ;;  %9419 = vmatprep.mubr.msk.f32.mxu1 %vm10352_vm0, %v10353_v1  ;;  %v7056_v47 = vsub.f32 %v7054_v4, %v7055_v45 }
 0x572   :  { %v5985_v61 = vpop.f32.mrb[72].mxu1  ;;  %10065 = vmatprep.subr.bf16.mxu1 %v10351_v0 }
 0x573   :  { %9953 = vmatpush3.bf16.msra.mxu0 %v10486_v38  ;;  %v5986_v2 = vadd.f32 %v5985_v61, %v5911_v57  ;;  %v9311_v7 = vpop.f32.mrb[73].mxu1  ;;  %v7057_v48 = vand.u32 4294901760, %v7056_v47  ;;  %v7991_v47 = vlaneseq }
 0x574   :  { %9954 = vmatprep.subr.bf16.mxu0 %v10351_v0 }
 0x575   :  { %10067 = vmatpush3.bf16.msra.mxu1 %v10530_v6 }
 0x576   :  { %9211 = vmatmul.mubr.f32.vlgmr.msra.gmra.mrb[8].mxu0 %v5084_v39  ;;  %10068 = vmatprep.subr.bf16.mxu1 %v10351_v0 }
 0x577   :  { %9956 = vmatpush3.bf16.msra.mxu0 %v10457_v12  ;;  %9221 = vmatprep.mubr.msk.f32.mxu0 %vm10352_vm0, %v10353_v1 }
 0x578   :  { %9957 = vmatprep.subr.bf16.mxu0 %v10351_v0  ;;  %9420 = vmatmul.mubr.f32.vlgmr.msra.gmra.mrb[80].mxu1 %v6559_v11 }
 0x579   :  { %10070 = vmatpush3.bf16.msra.mxu1 %v10564_v21  ;;  %9430 = vmatprep.mubr.msk.f32.mxu1 %vm10352_vm0, %v10353_v1 }
 0x57a   :  { %10071 = vmatprep.subr.bf16.mxu1 %v10351_v0 }
 0x57b   :  { %9959 = vmatpush3.bf16.msra.mxu0 %v10462_v18 }
 0x57c   :  { %9960 = vmatprep.subr.bf16.mxu0 %v10351_v0 }
 0x57d   :  { %10073 = vmatpush3.bf16.msra.mxu1 %v10568_v22 }
 0x57e   :  { %9222 = vmatmul.mubr.f32.vlgmr.msra.gmra.mrb[8].mxu0 %v5085_v41  ;;  %10074 = vmatprep.subr.bf16.mxu1 %v10351_v0 }
 0x57f   :  { %9962 = vmatpush3.bf16.msra.mxu0 %v10503_v42  ;;  %9232 = vmatprep.mubr.msk.f32.mxu0 %vm10352_vm0, %v10353_v1 }
 0x580   :  { %9963 = vmatprep.subr.bf16.mxu0 %v10351_v0  ;;  %9431 = vmatmul.mubr.f32.vlgmr.msra.gmra.mrb[82].mxu1 %v6557_v9 }
 0x581   :  { %10076 = vmatpush3.bf16.msra.mxu1 %v10525_v62  ;;  %9441 = vmatprep.mubr.msk.f32.mxu1 %vm10352_vm0, %v10353_v1 }
 0x582   :  { %10077 = vmatprep.subr.bf16.mxu1 %v10351_v0 }
 0x583   :  { %9965 = vmatpush3.bf16.msra.mxu0 %v10509_v46 }
 0x584   :  { %9966 = vmatprep.subr.bf16.mxu0 %v10351_v0 }
 0x585   :  { %10079 = vmatpush3.bf16.msra.mxu1 %v10530_v6 }
 0x586   :  { %9233 = vmatmul.mubr.f32.vlgmr.msra.gmra.mrb[8].mxu0 %v5083_v32 }
 0x587   :  { %9968 = vmatpush3.bf16.msra.mxu0 %v10457_v12  ;;  %9243 = vmatprep.mubr.msk.f32.mxu0 %vm10352_vm0, %v10353_v1 }
 0x588   :  { %9969 = vmatprep.subr.bf16.mxu0 %v10351_v0  ;;  %9442 = vmatmul.mubr.f32.vlgmr.msra.gmra.mrb[84].mxu1 %v6557_v9 }
 0x58b   :  { %9971 = vmatpush3.bf16.msra.mxu0 %v10462_v18 }
 0x58c   :  { %10008 = vmatprep.subr.bf16.mxu0 %v10351_v0 }
 0x58e   :  { %9244 = vmatmul.mubr.f32.vlgmr.msra.gmra.mrb[8].mxu0 %v5083_v32  ;;  %v11034_v32 = vld [vmem:[%s11164_s5] ss:$0 sm:$0xff] }
 0x58f   :  { %10010 = vmatpush3.bf16.msra.mxu0 %v10457_v12  ;;  %9320 = vmatprep.mubr.msk.f32.mxu0 %vm10352_vm0, %v10353_v1 }
 0x590   :  { %10011 = vmatprep.subr.bf16.mxu0 %v10351_v0 }
 0x593   :  { %10013 = vmatpush3.bf16.msra.mxu0 %v10462_v18 }
 0x594   :  { %10014 = vmatprep.subr.bf16.mxu0 %v10351_v0 }
 0x661   :  { %v5495_v16 = vpop.f32.mrb[8].mxu0 }
 0x662   :  { %v5989_v23 = vadd.f32 %v5986_v2, %v5495_v16  ;;  %v5996_v24 = vsel %vm82_vm1, %v5495_v16, 0  ;;  %v9245_v25 = vpop.f32.mrb[9].mxu0  ;;  %v4026_v16 = vpop.xlane.xlu1 %4025 }
 0x663   :  { %v6067_v26 = vand.u32 4294901760, %v5996_v24 }
 0x664   :  { %10263 = vtanh.f32 %v5989_v23 }
 0x665   :  { %v6068_v27 = vsub.f32 %v5996_v24, %v6067_v26 }
 0x667   :  { %v6069_v28 = vand.u32 4294901760, %v6068_v27 }
 0x669   :  { %v6070_v29 = vsub.f32 %v6068_v27, %v6069_v28 }
 0x66b   :  { %v6071_v30 = vand.u32 4294901760, %v6070_v29 }
 0x66d   :  { %9321 = vmatmul.mubr.f32.vlgmr.msra.gmra.mrb[10].mxu0 %v6071_v30 }
 0x66e   :  { %v10264_v31 = vpop.eup %10263  ;;  %10016 = vmatpush3.bf16.msra.mxu0 %v10472_v35  ;;  %9331 = vmatprep.mubr.msk.f32.mxu0 %vm10352_vm0, %v10353_v1 }
 0x66f   :  { %10017 = vmatprep.subr.bf16.mxu0 %v10351_v0  ;;  %v5991_v39 = vmul.f32 %v11034_v32, %v10264_v31 }
 0x671   :  { %v5992_v41 = vsel %vm1072_vm3, %v5991_v39, 0.0 }
 0x672   :  { %10019 = vmatpush3.bf16.msra.mxu0 %v10475_v36  ;;  %5993 = vadd.xlane.f32.xlu1 %v5992_v41 }
 0x673   :  { %10020 = vmatprep.subr.bf16.mxu0 %v10351_v0 }
 0x675   :  { %9332 = vmatmul.mubr.f32.vlgmr.msra.gmra.mrb[10].mxu0 %v6067_v26 }
 0x676   :  { %10022 = vmatpush3.bf16.msra.mxu0 %v10481_v37  ;;  %9342 = vmatprep.mubr.msk.f32.mxu0 %vm10352_vm0, %v10353_v1 }
 0x677   :  { %10023 = vmatprep.subr.bf16.mxu0 %v10351_v0 }
 0x67a   :  { %10025 = vmatpush3.bf16.msra.mxu0 %v10486_v38 }
 0x67b   :  { %10026 = vmatprep.subr.bf16.mxu0 %v10351_v0 }
 0x67d   :  { %9343 = vmatmul.mubr.f32.vlgmr.msra.gmra.mrb[10].mxu0 %v6068_v27 }
 0x67e   :  { %10028 = vmatpush3.bf16.msra.mxu0 %v10457_v12  ;;  %9353 = vmatprep.mubr.msk.f32.mxu0 %vm10352_vm0, %v10353_v1 }
 0x67f   :  { %10029 = vmatprep.subr.bf16.mxu0 %v10351_v0 }
 0x682   :  { %10031 = vmatpush3.bf16.msra.mxu0 %v10462_v18 }
 0x683   :  { %10032 = vmatprep.subr.bf16.mxu0 %v10351_v0 }
 0x685   :  { %9354 = vmatmul.mubr.f32.vlgmr.msra.gmra.mrb[10].mxu0 %v6069_v28  ;;  %v7976_v28 = vstv %s11165_s6 }
 0x686   :  { %10034 = vmatpush3.bf16.msra.mxu0 %v10503_v42  ;;  %9364 = vmatprep.mubr.msk.f32.mxu0 %vm10352_vm0, %v10353_v1 }
 0x687   :  { %10035 = vmatprep.subr.bf16.mxu0 %v10351_v0 }
 0x68a   :  { %10037 = vmatpush3.bf16.msra.mxu0 %v10509_v46 }
 0x68b   :  { %10038 = vmatprep.subr.bf16.mxu0 %v10351_v0 }
 0x68d   :  { %9365 = vmatmul.mubr.f32.vlgmr.msra.gmra.mrb[10].mxu0 %v6067_v26 }
 0x68e   :  { %10040 = vmatpush3.bf16.msra.mxu0 %v10457_v12  ;;  %9375 = vmatprep.mubr.msk.f32.mxu0 %vm10352_vm0, %v10353_v1 }
 0x68f   :  { %10041 = vmatprep.subr.bf16.mxu0 %v10351_v0 }
 0x692   :  { %10043 = vmatpush3.bf16.msra.mxu0 %v10462_v18 }
 0x693   :  { %10080 = vmatprep.subr.bf16.mxu0 %v10351_v0 }
 0x695   :  { %9376 = vmatmul.mubr.f32.vlgmr.msra.gmra.mrb[10].mxu0 %v6067_v26 }
 0x696   :  { %10082 = vmatpush3.bf16.msra.mxu0 %v10525_v62  ;;  %9452 = vmatprep.mubr.msk.f32.mxu0 %vm10352_vm0, %v10353_v1 }
 0x697   :  { %10083 = vmatprep.subr.bf16.mxu0 %v10351_v0 }
 0x69a   :  { %10085 = vmatpush3.bf16.msra.mxu0 %v10530_v6 }
 0x69b   :  { %10086 = vmatprep.subr.bf16.mxu0 %v10351_v0 }
 0x69d   :  { %9453 = vmatmul.mubr.f32.vlgmr.msra.gmra.mrb[12].mxu0 %v7057_v48  ;;  %v7992_v48 = vshrl.u32 %v7991_v47, 7 }
 0x69e   :  { %10088 = vmatpush3.bf16.msra.mxu0 %v10537_v15  ;;  %9463 = vmatprep.mubr.msk.f32.mxu0 %vm10352_vm0, %v10353_v1  ;;  %v6563_v15 = vpop.f32.mrb[74].mxu1 }
 0x69f   :  { %10089 = vmatprep.subr.bf16.mxu0 %v10351_v0 }
 0x6a2   :  { %10091 = vmatpush3.bf16.msra.mxu0 %v10541_v17  ;;  %v9388_v17 = vpop.f32.mrb[75].mxu1 }
 0x6a3   :  { %10092 = vmatprep.subr.bf16.mxu0 %v10351_v0  ;;  %v7993_v17 = vsub.s32 0, %v7992_v48 }
 0x6a5   :  { %9464 = vmatmul.mubr.f32.vlgmr.msra.gmra.mrb[12].mxu0 %v7053_v44 }
 0x6a6   :  { %10094 = vmatpush3.bf16.msra.mxu0 %v10547_v19  ;;  %9474 = vmatprep.mubr.msk.f32.mxu0 %vm10352_vm0, %v10353_v1  ;;  %v6654_v19 = vpop.f32.mrb[76].mxu1 }
 0x6a7   :  { %10095 = vmatprep.subr.bf16.mxu0 %v10351_v0 }
 0x6aa   :  { %10097 = vmatpush3.bf16.msra.mxu0 %v10552_v20  ;;  %v9399_v20 = vpop.f32.mrb[77].mxu1 }
 0x6ab   :  { %10098 = vmatprep.subr.bf16.mxu0 %v10351_v0 }
 0x6ad   :  { %9475 = vmatmul.mubr.f32.vlgmr.msra.gmra.mrb[12].mxu0 %v7054_v4 }
 0x6ae   :  { %10100 = vmatpush3.bf16.msra.mxu0 %v10525_v62  ;;  %9485 = vmatprep.mubr.msk.f32.mxu0 %vm10352_vm0, %v10353_v1 }
 0x6af   :  { %10101 = vmatprep.subr.bf16.mxu0 %v10351_v0 }
 0x6b2   :  { %10103 = vmatpush3.bf16.msra.mxu0 %v10530_v6 }
 0x6b3   :  { %10104 = vmatprep.subr.bf16.mxu0 %v10351_v0 }
 0x6b5   :  { %9486 = vmatmul.mubr.f32.vlgmr.msra.gmra.mrb[12].mxu0 %v7055_v45 }
 0x6b6   :  { %10106 = vmatpush3.bf16.msra.mxu0 %v10564_v21  ;;  %9496 = vmatprep.mubr.msk.f32.mxu0 %vm10352_vm0, %v10353_v1  ;;  %v6734_v21 = vpop.f32.mrb[78].mxu1 }
 0x6b7   :  { %10107 = vmatprep.subr.bf16.mxu0 %v10351_v0 }
 0x6ba   :  { %10109 = vmatpush3.bf16.msra.mxu0 %v10568_v22 }
 0x6bb   :  { %10110 = vmatprep.subr.bf16.mxu0 %v10351_v0 }
 0x6bd   :  { %9497 = vmatmul.mubr.f32.vlgmr.msra.gmra.mrb[12].mxu0 %v7053_v44 }
 0x6be   :  { %10112 = vmatpush3.bf16.msra.mxu0 %v10525_v62  ;;  %9507 = vmatprep.mubr.msk.f32.mxu0 %vm10352_vm0, %v10353_v1  ;;  %v6655_v62 = vadd.f32 %v6654_v19, %v6563_v15  ;;  %v8000_v15 = vsub.s32 1, %v7992_v48 }
 0x6bf   :  { %10113 = vmatprep.subr.bf16.mxu0 %v10351_v0 }
 0x6c0   :  { %v6735_v22 = vadd.f32 %v6734_v21, %v6655_v62 }
 0x6c2   :  { %10115 = vmatpush3.bf16.msra.mxu0 %v10530_v6  ;;  %v9410_v6 = vpop.f32.mrb[79].mxu1 }
 0x6c3   :  { %10116 = vmatprep.subr.bf16.mxu0 %v10351_v0  ;;  %v6811_v49 = vpop.f32.mrb[80].mxu1 }
 0x6c4   :  { %v6812_v50 = vadd.f32 %v6811_v49, %v6735_v22  ;;  %v9421_v51 = vpop.f32.mrb[81].mxu1 }
 0x6c5   :  { %9508 = vmatmul.mubr.f32.vlgmr.msra.gmra.mrb[12].mxu0 %v7053_v44  ;;  %v6894_v52 = vpop.f32.mrb[82].mxu1 }
 0x6c6   :  { %10118 = vmatpush3.bf16.msra.mxu0 %v10457_v12  ;;  %9518 = vmatprep.mubr.msk.f32.mxu0 %vm10352_vm0, %v10353_v1  ;;  %v6895_v53 = vadd.f32 %v6894_v52, %v6812_v50  ;;  %v9432_v54 = vpop.f32.mrb[83].mxu1 }
 0x6c7   :  { %10119 = vmatprep.subr.bf16.mxu0 %v10351_v0  ;;  %v6969_v55 = vpop.f32.mrb[84].mxu1 }
 0x6c8   :  { %v6970_v56 = vadd.f32 %v6969_v55, %v6895_v53  ;;  %v9443_v57 = vpop.f32.mrb[85].mxu1 }
 0x6ca   :  { %10121 = vmatpush3.bf16.msra.mxu0 %v10462_v18 }
 0x6cb   :  { %10122 = vmatprep.subr.bf16.mxu0 %v10351_v0 }
 0x6ff   :  { %v5994_v23 = vpop.xlane.xlu1 %5993 }
 0x768   :  { %v6479_v58 = vpop.f32.mrb[10].mxu0 }
 0x769   :  { %v6973_v59 = vadd.f32 %v6970_v56, %v6479_v58  ;;  %v7470_v60 = vsel %vm82_vm1, %v6479_v58, 0  ;;  %v9377_v61 = vpop.f32.mrb[11].mxu0 }
 0x76a   :  { %v7541_v63 = vand.u32 4294901760, %v7470_v60 }
 0x76b   :  { %10265 = vtanh.f32 %v6973_v59 }
 0x76c   :  { %v7542_v2 = vsub.f32 %v7470_v60, %v7541_v63 }
 0x76e   :  { %v7543_v3 = vand.u32 4294901760, %v7542_v2 }
 0x770   :  { %v7544_v7 = vsub.f32 %v7542_v2, %v7543_v3 }
 0x772   :  { %v7545_v9 = vand.u32 4294901760, %v7544_v7 }
 0x774   :  { %9519 = vmatmul.mubr.f32.vlgmr.msra.gmra.mrb[12].mxu0 %v7545_v9 }
 0x775   :  { %v10266_v10 = vpop.eup %10265  ;;  %10124 = vmatpush3.bf16.msra.mxu0 %v10472_v35  ;;  %9529 = vmatprep.mubr.msk.f32.mxu0 %vm10352_vm0, %v10353_v1 }
 0x776   :  { %10125 = vmatprep.subr.bf16.mxu0 %v10351_v0  ;;  %v6975_v11 = vmul.f32 %v11034_v32, %v10266_v10 }
 0x778   :  { %v6976_v14 = vsel %vm1072_vm3, %v6975_v11, 0.0 }
 0x779   :  { %10127 = vmatpush3.bf16.msra.mxu0 %v10475_v36  ;;  %6977 = vadd.xlane.f32.xlu0 %v6976_v14 }
 0x77a   :  { %10128 = vmatprep.subr.bf16.mxu0 %v10351_v0 }
 0x77c   :  { %9530 = vmatmul.mubr.f32.vlgmr.msra.gmra.mrb[12].mxu0 %v7541_v63 }
 0x77d   :  { %10130 = vmatpush3.bf16.msra.mxu0 %v10481_v37  ;;  %9540 = vmatprep.mubr.msk.f32.mxu0 %vm10352_vm0, %v10353_v1 }
 0x77e   :  { %10131 = vmatprep.subr.bf16.mxu0 %v10351_v0 }
 0x781   :  { %10133 = vmatpush3.bf16.msra.mxu0 %v10486_v38 }
 0x782   :  { %10134 = vmatprep.subr.bf16.mxu0 %v10351_v0 }
 0x784   :  { %9541 = vmatmul.mubr.f32.vlgmr.msra.gmra.mrb[12].mxu0 %v7542_v2 }
 0x785   :  { %10136 = vmatpush3.bf16.msra.mxu0 %v10457_v12  ;;  %9551 = vmatprep.mubr.msk.f32.mxu0 %vm10352_vm0, %v10353_v1 }
 0x786   :  { %10137 = vmatprep.subr.bf16.mxu0 %v10351_v0 }
 0x789   :  { %10139 = vmatpush3.bf16.msra.mxu0 %v10462_v18 }
 0x78a   :  { %10140 = vmatprep.subr.bf16.mxu0 %v10351_v0 }
 0x78c   :  { %9552 = vmatmul.mubr.f32.vlgmr.msra.gmra.mrb[12].mxu0 %v7543_v3 }
 0x78d   :  { %10142 = vmatpush3.bf16.msra.mxu0 %v10503_v42  ;;  %9562 = vmatprep.mubr.msk.f32.mxu0 %vm10352_vm0, %v10353_v1 }
 0x78e   :  { %10143 = vmatprep.subr.bf16.mxu0 %v10351_v0 }
 0x791   :  { %10145 = vmatpush3.bf16.msra.mxu0 %v10509_v46  ;;  %v1075_v46 = vpop.xlane.xlu0 %1074 }
 0x792   :  { %10146 = vmatprep.subr.bf16.mxu0 %v10351_v0 }
 0x794   :  { %9563 = vmatmul.mubr.f32.vlgmr.msra.gmra.mrb[12].mxu0 %v7541_v63 }
 0x795   :  { %10148 = vmatpush3.bf16.msra.mxu0 %v10457_v12  ;;  %9573 = vmatprep.mubr.msk.f32.mxu0 %vm10352_vm0, %v10353_v1  ;;  %v2058_v12 = vpop.xlane.xlu0 %2057 }
 0x796   :  { %10149 = vmatprep.subr.bf16.mxu0 %v10351_v0  ;;  %v7963_v0 = vsel %vm7962_vm4, %v1075_v46, %v2058_v12 }
 0x799   :  { %10151 = vmatpush3.bf16.msra.mxu0 %v10462_v18  ;;  %v5010_v1 = vpop.xlane.xlu0 %5009  ;;  %v7965_v18 = vsel %vm7964_vm5, %v7963_v0, %v3042_v13 }
 0x79a   :  { %v7967_v24 = vsel %vm7966_vm6, %v7965_v18, %v4026_v16 }
 0x79b   :  { %v7969_v26 = vsel %vm7968_vm7, %v7967_v24, %v5010_v1 }
 0x79c   :  { %9574 = vmatmul.mubr.f32.vlgmr.msra.gmra.mrb[12].mxu0 %v7541_v63  ;;  %v7971_v27 = vsel %vm7970_vm8, %v7969_v26, %v5994_v23 }
 0x806   :  { %v6978_v25 = vpop.xlane.xlu0 %6977 }
 0x807   :  { %v7973_v29 = vsel %vm7972_vm9, %v7971_v27, %v6978_v25 }
 0x86f   :  { %v7953_v35 = vpop.f32.mrb[12].mxu0 }
 0x870   :  { %10267 = vtanh.f32 %v7953_v35  ;;  %v9575_v36 = vpop.f32.mrb[13].mxu0 }
 0x87a   :  { %v10268_v37 = vpop.eup %10267 }
 0x87b   :  { %v7958_v38 = vmul.f32 %v11034_v32, %v10268_v37  ;;  %v71_v32 = vld [vmem:[%s11161_s2] sm:$0x3]  ;;  %s10354_s2 = smov 32  }
 0x87d   :  { %v7959_v42 = vsel %vm1072_vm3, %v7958_v38, 0.0 }
 0x87e   :  { %7960 = vadd.xlane.f32.xlu1 %v7959_v42 }
 0x90b   :  { %v7961_v30 = vpop.xlane.xlu1 %7960 }
 0x90c   :  { %v7975_v31 = vsel %vm7974_vm10, %v7973_v29, %v7961_v30 }
 0x90d   :  { %v7977_v39 = vadd.f32 %v7976_v28, %v7975_v31 }
 0x90f   :  { %v7978_v41 = vmul.f32 %v7977_v39, %v71_v32 }
 0x911   :  { %v7980_v33 = vsel %vm7979_vm11, %v7978_v41, -inf }
 0x912   :  { %7981 = vmax.xlane.f32.xlu0 %v7980_v33 }
 0x99f   :  { %v7982_v34 = vpop.xlane.xlu0 %7981 }
 0x9a0   :  { %v7983_v40 = vsub.f32 %v7978_v41, %v7982_v34 }
 0x9a2   :  { %v7984_v43 = vmul.f32 1.442695, %v7983_v40 }
 0x9a4   :  { %10269 = vpow2.f32 %v7984_v43 }
 0x9ae   :  { %v10270_v44 = vpop.eup %10269 }
 0x9af   :  { %v7986_v4 = vsel %vm7979_vm11, %v10270_v44, 0.0 }
 0x9b0   :  { %7987 = vadd.xlane.f32.xlu1 %v7986_v4 }
 0xa3d   :  { %v7988_v45 = vpop.xlane.xlu1 %7987 }
 0xa3e   :  { %10271 = vrcp.f32 %v7988_v45 }
 0xa48   :  { %v10272_v19 = vpop.eup %10271 }
 0xa49   :  { %v7990_v62 = vmul.f32 %v10272_v19, %v10270_v44 }
 0xa4b   :  { %v8001_v20 = vrot.slane %v7990_v62, %v8000_v15  ;;  %v7994_v21 = vrot.slane %v7990_v62, %v7993_v17 }
 0xa4d   :  { %8003 = vbcast.lane.b32.xlu1 %v8001_v20, 256  ;;  %7996 = vbcast.lane.b32.xlu0 %v7994_v21, 256 }
 0xa51   :  { %8026 = vrot.lane.b32.xlu1 %v7990_v62, %s10354_s2 }
 0xabf   :  { %v8004_v22 = vpop.permute.xlu1 %8003  ;;  %v7997_v6 = vpop.permute.xlu0 %7996 }
 0xac0   :  { %v8006_v49 = vmul.f32 %v10913_v8, %v8004_v22  ;;  %v8005_v50 = vmul.f32 %v10910_v5, %v7997_v6 }
 0xac2   :  { %v8014_v51 = vsel %vm82_vm1, %v8006_v49, 0.0  ;;  %v8007_v52 = vsel %vm82_vm1, %v8005_v50, 0.0 }
 0xac3   :  { %v8015_v53 = vrot.slane %v8014_v51, 4  ;;  %v8008_v54 = vrot.slane %v8007_v52, 4  ;;  %v8027_v8 = vpop.permute.xlu1 %8026 }
 0xac5   :  { %v8016_v55 = vadd.f32 %v8015_v53, %v8014_v51  ;;  %v8009_v56 = vadd.f32 %v8008_v54, %v8007_v52 }
 0xac7   :  { %v8017_v57 = vrot.slane %v8016_v55, 2  ;;  %v8010_v58 = vrot.slane %v8009_v56, 2 }
 0xac9   :  { %v8018_v59 = vadd.f32 %v8017_v57, %v8016_v55  ;;  %v8011_v60 = vadd.f32 %v8010_v58, %v8009_v56 }
 0xacb   :  { %v8019_v61 = vrot.slane %v8018_v59, 1  ;;  %v8012_v63 = vrot.slane %v8011_v60, 1 }
 0xacd   :  { %v8020_v2 = vadd.f32 %v8019_v61, %v8018_v59  ;;  %v8013_v3 = vadd.f32 %v8012_v63, %v8011_v60 }
 0xacf   :  { %v8023_v5 = vsel %vm574_vm2, %v8020_v2, %v8013_v3 }
 0xad0   :  { %v8029_v7 = vsel %vm82_vm1, %v8023_v5, %v8027_v8 }
 0xad1   :  { %v8031_v9 = vsel %vm8030_vm12, %v8029_v7, 0.0 }
 0xad2   :  { %8032 = vst [vmem:[%s11166_s7] sm:$0x3] %v8031_v9 }
 0xad3   :  { %8037 = vsyncpa [#allocation4], 1 }
 0xad4   :  { %8038 = vsyncpa [#allocation6], 1 }

</bundles_post_ra>
